<compile_context>
chip_gen: v7x
topology: tpu7x:2x2x1
jax: 0.10.0
libtpu: 0.0.40
codegen_flags: <defaults>
</compile_context>

<pallas_src>
import math
import functools

import jax
import jax.numpy as jnp
from jax.experimental import pallas as pl
from jax.experimental.pallas import tpu as pltpu

# ----- hyperparameters (the PyTorch file uses module-level globals) -----
src_vocab_size = 16
d_model = 32
d_q = d_k = d_v = 16
n_heads = 4
d_ff = 64
n_layers = 2

LN_EPS = 1e-5
MASK_FILL = -1000000000.0


def _layernorm(y, gamma, beta):
    mu = jnp.mean(y, axis=-1, keepdims=True)
    var = jnp.mean((y - mu) ** 2, axis=-1, keepdims=True)
    return (y - mu) * jax.lax.rsqrt(var + LN_EPS) * gamma + beta


def positional_encoding_table(max_len, dm):
    position = jnp.arange(max_len, dtype=jnp.float32)[:, None]
    div_term = jnp.exp(jnp.arange(0, dm, 2, dtype=jnp.float32)
                       * (-math.log(10000.0) / dm))
    pe = jnp.zeros((max_len, dm), dtype=jnp.float32)
    pe = pe.at[:, 0::2].set(jnp.sin(position * div_term))
    pe = pe.at[:, 1::2].set(jnp.cos(position * div_term))
    return pe


# --------------------------------------------------------------------------
# Per-sequence fused encoder kernel (grid axis = batch, "parallel")
# --------------------------------------------------------------------------
def _encoder_kernel(x_ref, bias_ref, wqkv_ref, wo_ref, wff1_ref, wff2_ref,
                    vec_ref, out_ref, attn_ref, *, seq):
    S = seq
    hd = n_heads * d_v                                    # 64

    x = x_ref[0]                                          # (S, D) f32 (emb+PE)
    # Key-padding additive bias, hoisted out of the layer/head loops.
    bias = jnp.broadcast_to(bias_ref[0], (S, S))          # (S, S) f32
    scale = jnp.float32(1.0 / math.sqrt(d_k))
    # TODO(synk): nn.Dropout after positional encoding is eval-mode identity.

    for li in range(n_layers):
        w_qkv = wqkv_ref[li]                              # (D, H*3*d) head-major
        w_o = wo_ref[li]                                  # (hd, D)
        w_1 = wff1_ref[li]                                # (D, d_ff)
        w_2 = wff2_ref[li]                                # (d_ff, D)
        vec = vec_ref[li]                                 # (8, 3*hd) bias/LN slab
        b_qkv = vec[0:1, :]                               # (1, H*3*d)
        b_o = vec[1:2, 0:d_model]
        ln1_g = vec[2:3, 0:d_model]
        ln1_b = vec[3:4, 0:d_model]
        b_1 = vec[4:5, 0:d_ff]
        b_2 = vec[5:6, 0:d_model]
        ln2_g = vec[6:7, 0:d_model]
        ln2_b = vec[7:8, 0:d_model]

        # fused, head-major QKV projection: columns = [h0:q|k|v, h1:q|k|v, ...]
        qkv = jnp.dot(x, w_qkv, preferred_element_type=jnp.float32) + b_qkv

        ctx_parts = []
        attn_parts = []
        for h in range(n_heads):                          # lane-contiguous slices,
            base = h * 3 * d_q                            # no 3-D transposes
            q_h = qkv[:, base:base + d_q]                 # (S, d)
            k_h = qkv[:, base + d_q:base + 2 * d_q]       # (S, d)
            v_h = qkv[:, base + 2 * d_q:base + 3 * d_q]   # (S, d)

            scores = jax.lax.dot_general(                 # q @ k^T (contract last dims)
                q_h, k_h, (((1,), (1,)), ((), ())),
                preferred_element_type=jnp.float32) * scale + bias

            m = jnp.max(scores, axis=-1, keepdims=True)
            e = jnp.exp(scores - m)
            attn_h = e / jnp.sum(e, axis=-1, keepdims=True)   # exact softmax

            ctx_parts.append(jnp.dot(attn_h, v_h,
                                     preferred_element_type=jnp.float32))
            attn_parts.append(attn_h)

        ctx = jnp.concatenate(ctx_parts, axis=1)          # (S, hd) lane concat
        attn_all = jnp.concatenate(attn_parts, axis=0)    # (H*S, S) sublane concat

        attn_out = jnp.dot(ctx, w_o, preferred_element_type=jnp.float32) + b_o
        y = _layernorm(attn_out + x, ln1_g, ln1_b)

        # position-wise FFN (Conv1d kernel_size=1 == per-token Linear)
        h1 = jnp.dot(y, w_1, preferred_element_type=jnp.float32) + b_1
        h1 = jnp.maximum(h1, 0.0)
        h2 = jnp.dot(h1, w_2, preferred_element_type=jnp.float32) + b_2
        x = _layernorm(h2 + y, ln2_g, ln2_b)

        attn_ref[0, li] = attn_all                        # no diagonal-block slicing

    # TODO(synk): out last dim is 32 lanes (masked store); flattening to
    # (1, S*d_model) would need an in-kernel relayout at these shapes.
    out_ref[0] = x.astype(out_ref.dtype)


# --------------------------------------------------------------------------
# Parameter packing (stacked over layers) and wrapper
# --------------------------------------------------------------------------
def init_params(key):
    keys = jax.random.split(key, 1 + n_layers)
    emb = jax.random.normal(keys[0], (src_vocab_size, d_model), jnp.float32) * 0.02
    hd = n_heads * d_q
    wqkv, wo, w1, w2, vec = [], [], [], [], []
    for li in range(n_layers):
        ks = jax.random.split(keys[1 + li], 8)
        # head-major fused QKV: columns ordered [h, (q|k|v), d]
        w = jax.random.normal(ks[0], (d_model, n_heads, 3, d_q), jnp.float32) * 0.02
        wqkv.append(w.reshape(d_model, n_heads * 3 * d_q))
        wo.append(jax.random.normal(ks[1], (hd, d_model), jnp.float32) * 0.02)
        w1.append(jax.random.normal(ks[2], (d_model, d_ff), jnp.float32) * 0.02)
        w2.append(jax.random.normal(ks[3], (d_ff, d_model), jnp.float32) * 0.02)
        # packed bias / LayerNorm slab rows:
        #   0: b_qkv (head-major) | 1: b_o | 2: ln1_gamma | 3: ln1_beta
        #   4: b_ff1 | 5: b_ff2 | 6: ln2_gamma | 7: ln2_beta
        v = jnp.zeros((8, 3 * hd), jnp.float32)
        v = v.at[0, :].set(jax.random.normal(ks[4], (3 * hd,), jnp.float32) * 0.02)
        v = v.at[1, :d_model].set(jax.random.normal(ks[5], (d_model,), jnp.float32) * 0.02)
        v = v.at[2, :d_model].set(1.0)
        v = v.at[4, :d_ff].set(jax.random.normal(ks[6], (d_ff,), jnp.float32) * 0.02)
        v = v.at[5, :d_model].set(jax.random.normal(ks[7], (d_model,), jnp.float32) * 0.02)
        v = v.at[6, :d_model].set(1.0)
        vec.append(v)
    return dict(emb=emb,
                wqkv=jnp.stack(wqkv), wo=jnp.stack(wo),
                wff1=jnp.stack(w1), wff2=jnp.stack(w2),
                vec=jnp.stack(vec))


def encoder_forward(enc_inputs, params):
    """enc_inputs: (B, S) int32 token ids.  Returns (enc_outputs, [attn...])."""
    B, S = enc_inputs.shape
    ids = enc_inputs.astype(jnp.int32)
    hd = n_heads * d_v

    # Embedding gather + positional encoding in the XLA wrapper (cheap gather,
    # avoids the in-kernel (N, V) one-hot matmul).
    x = params['emb'][ids] + positional_encoding_table(S, d_model)[None, :, :]
    x = x.astype(jnp.float32)
    # Key-padding mask as a precomputed f32 additive bias (one compare).
    bias = jnp.where(ids == 0, jnp.float32(MASK_FILL),
                     jnp.float32(0.0))[:, None, :]            # (B, 1, S)

    per_layer_flops = (2 * S * d_model * 3 * hd               # fused QKV
                       + 2 * n_heads * S * S * d_k * 2        # scores + ctx
                       + 2 * S * hd * d_model                 # Wo
                       + 2 * S * d_model * d_ff * 2)          # FFN
    cost = pl.CostEstimate(
        flops=int(B * n_layers * per_layer_flops),
        transcendentals=int(B * n_layers * (n_heads * S * S + 2 * S)),
        bytes_accessed=int(4 * (x.size + bias.size
                                + params['wqkv'].size + params['wo'].size
                                + params['wff1'].size + params['wff2'].size
                                + params['vec'].size
                                + B * S * d_model
                                + B * n_layers * n_heads * S * S)))

    kernel = functools.partial(_encoder_kernel, seq=S)
    out, attn_packed = pl.pallas_call(
        kernel,
        grid=(B,),
        in_specs=[
            pl.BlockSpec((1, S, d_model), lambda b: (b, 0, 0)),            # x
            pl.BlockSpec((1, 1, S), lambda b: (b, 0, 0)),                  # pad bias
            pl.BlockSpec((n_layers, d_model, 3 * hd), lambda b: (0, 0, 0)),  # wqkv
            pl.BlockSpec((n_layers, hd, d_model), lambda b: (0, 0, 0)),      # wo
            pl.BlockSpec((n_layers, d_model, d_ff), lambda b: (0, 0, 0)),    # wff1
            pl.BlockSpec((n_layers, d_ff, d_model), lambda b: (0, 0, 0)),    # wff2
            pl.BlockSpec((n_layers, 8, 3 * hd), lambda b: (0, 0, 0)),        # vec slab
        ],
        out_specs=(
            pl.BlockSpec((1, S, d_model), lambda b: (b, 0, 0)),
            pl.BlockSpec((1, n_layers, n_heads * S, S), lambda b: (b, 0, 0, 0)),
        ),
        out_shape=(
            jax.ShapeDtypeStruct((B, S, d_model), jnp.float32),
            jax.ShapeDtypeStruct((B, n_layers, n_heads * S, S), jnp.float32),
        ),
        compiler_params=pltpu.CompilerParams(
            dimension_semantics=("parallel",),
            vmem_limit_bytes=64 * 1024 * 1024),
        cost_estimate=cost,
    )(x, bias, params['wqkv'], params['wo'], params['wff1'], params['wff2'],
      params['vec'])

    attn = attn_packed.reshape(B, n_layers, n_heads, S, S)
    return out, [attn[:, li] for li in range(n_layers)]


# --------------------------------------------------------------------------
# Pure-JAX reference (mirrors the PyTorch forward, eval mode) for validation
# --------------------------------------------------------------------------
def _reference_forward(enc_inputs, params):
    hi = jax.lax.Precision.HIGHEST
    B, S = enc_inputs.shape
    x = params['emb'][enc_inputs] + positional_encoding_table(S, d_model)[None]
    pad = (enc_inputs == 0)
    attns = []
    for li in range(n_layers):
        vec = params['vec'][li]
        b_qkv = vec[0].reshape(n_heads, 3, d_q)
        b_o = vec[1, :d_model]
        ln1_g, ln1_b = vec[2, :d_model], vec[3, :d_model]
        b_1, b_2 = vec[4, :d_ff], vec[5, :d_model]
        ln2_g, ln2_b = vec[6, :d_model], vec[7, :d_model]
        wqkv = params['wqkv'][li].reshape(d_model, n_heads, 3, d_q)

        q = jnp.einsum('bsd,dhe->bhse', x, wqkv[:, :, 0, :],
                       precision=hi) + b_qkv[None, :, 0, None, :]
        k = jnp.einsum('bsd,dhe->bhse', x, wqkv[:, :, 1, :],
                       precision=hi) + b_qkv[None, :, 1, None, :]
        v = jnp.einsum('bsd,dhe->bhse', x, wqkv[:, :, 2, :],
                       precision=hi) + b_qkv[None, :, 2, None, :]
        scores = jnp.einsum('bhqd,bhkd->bhqk', q, k, precision=hi) / math.sqrt(d_k)
        scores = jnp.where(pad[:, None, None, :], MASK_FILL, scores)
        attn = jax.nn.softmax(scores, axis=-1)
        ctx = jnp.einsum('bhqk,bhkd->bhqd', attn, v, precision=hi)
        ctx = ctx.transpose(0, 2, 1, 3).reshape(B, S, n_heads * d_v)
        y = _layernorm(jnp.einsum('bsd,de->bse', ctx, params['wo'][li],
                                  precision=hi) + b_o + x, ln1_g, ln1_b)
        h = jnp.maximum(jnp.einsum('bsd,df->bsf', y, params['wff1'][li],
                                   precision=hi) + b_1, 0.0)
        h = jnp.einsum('bsf,fd->bsd', h, params['wff2'][li], precision=hi) + b_2
        x = _layernorm(h + y, ln2_g, ln2_b)
        attns.append(attn)
    return x, attns


if __name__ == "__main__":
    key = jax.random.PRNGKey(0)
    pkey, dkey = jax.random.split(key)
    params = init_params(pkey)

    B, S = 2, 8
    enc_inputs = jax.random.randint(dkey, (B, S), 1, src_vocab_size, dtype=jnp.int32)
    # add some padding tokens (id 0) to exercise the pad mask
    enc_inputs = enc_inputs.at[1, -3:].set(0)

    out, attns = encoder_forward(enc_inputs, params)
    jax.block_until_ready(out)
    for a in attns:
        jax.block_until_ready(a)

    assert out.shape == (B, S, d_model)
    assert all(a.shape == (B, n_heads, S, S) for a in attns)
    assert bool(jnp.all(jnp.isfinite(out)))

    ref_out, ref_attns = _reference_forward(enc_inputs, params)
    assert bool(jnp.allclose(out, ref_out, atol=1e-2, rtol=1e-2))
    for a, ra in zip(attns, ref_attns):
        assert bool(jnp.allclose(a, ra, atol=1e-2, rtol=1e-2))

    print("KERNEL_OK")
</pallas_src>

<mosaic_0001>
module attributes {stable_mosaic.version = 11 : i64} {
  func.func @_encoder_kernel(%arg0: i32, %arg1: memref<1x8x32xf32, #tpu.memory_space<vmem>>, %arg2: memref<1x1x8xf32, #tpu.memory_space<vmem>>, %arg3: memref<2x32x192xf32, #tpu.memory_space<vmem>>, %arg4: memref<2x64x32xf32, #tpu.memory_space<vmem>>, %arg5: memref<2x32x64xf32, #tpu.memory_space<vmem>>, %arg6: memref<2x64x32xf32, #tpu.memory_space<vmem>>, %arg7: memref<2x8x192xf32, #tpu.memory_space<vmem>>, %arg8: memref<1x8x32xf32, #tpu.memory_space<vmem>>, %arg9: memref<1x2x32x8xf32, #tpu.memory_space<vmem>>) attributes {dimension_semantics = [#tpu.dimension_semantics<parallel>], iteration_bounds = array<i64: 2>, scalar_prefetch = 0 : i64, scratch_operands = 0 : i64, tpu.core_type = #tpu.core_type<tc>, window_params = [{transform_indices = @transform_0, window_bounds = array<i64: 1, 8, 32>}, {transform_indices = @transform_1, window_bounds = array<i64: 1, 1, 8>}, {pipeline_mode = #tpu.pipeline_mode<synchronous>, transform_indices = @transform_2, window_bounds = array<i64: 2, 32, 192>}, {pipeline_mode = #tpu.pipeline_mode<synchronous>, transform_indices = @transform_3, window_bounds = array<i64: 2, 64, 32>}, {pipeline_mode = #tpu.pipeline_mode<synchronous>, transform_indices = @transform_4, window_bounds = array<i64: 2, 32, 64>}, {pipeline_mode = #tpu.pipeline_mode<synchronous>, transform_indices = @transform_5, window_bounds = array<i64: 2, 64, 32>}, {pipeline_mode = #tpu.pipeline_mode<synchronous>, transform_indices = @transform_6, window_bounds = array<i64: 2, 8, 192>}, {transform_indices = @transform_7, window_bounds = array<i64: 1, 8, 32>}, {transform_indices = @transform_8, window_bounds = array<i64: 1, 2, 32, 8>}]} {
    %c0 = arith.constant 0 : index
    %c0_0 = arith.constant 0 : index
    %c0_1 = arith.constant 0 : index
    %0 = vector.load %arg1[%c0, %c0_0, %c0_1] : memref<1x8x32xf32, #tpu.memory_space<vmem>>, vector<1x8x32xf32>
    %1 = vector.shape_cast %0 : vector<1x8x32xf32> to vector<8x32xf32>
    %c0_2 = arith.constant 0 : index
    %c0_3 = arith.constant 0 : index
    %c0_4 = arith.constant 0 : index
    %2 = vector.load %arg2[%c0_2, %c0_3, %c0_4] : memref<1x1x8xf32, #tpu.memory_space<vmem>>, vector<1x1x8xf32>
    %3 = vector.shape_cast %2 : vector<1x1x8xf32> to vector<1x8xf32>
    %4 = vector.shape_cast %3 : vector<1x8xf32> to vector<1x8xf32>
    %5 = vector.broadcast %4 : vector<1x8xf32> to vector<8x8xf32>
    %c0_5 = arith.constant 0 : index
    %c0_6 = arith.constant 0 : index
    %c0_7 = arith.constant 0 : index
    %6 = vector.load %arg3[%c0_5, %c0_6, %c0_7] : memref<2x32x192xf32, #tpu.memory_space<vmem>>, vector<1x32x192xf32>
    %7 = vector.shape_cast %6 : vector<1x32x192xf32> to vector<32x192xf32>
    %c0_8 = arith.constant 0 : index
    %c0_9 = arith.constant 0 : index
    %c0_10 = arith.constant 0 : index
    %8 = vector.load %arg4[%c0_8, %c0_9, %c0_10] : memref<2x64x32xf32, #tpu.memory_space<vmem>>, vector<1x64x32xf32>
    %9 = vector.shape_cast %8 : vector<1x64x32xf32> to vector<64x32xf32>
    %c0_11 = arith.constant 0 : index
    %c0_12 = arith.constant 0 : index
    %c0_13 = arith.constant 0 : index
    %10 = vector.load %arg5[%c0_11, %c0_12, %c0_13] : memref<2x32x64xf32, #tpu.memory_space<vmem>>, vector<1x32x64xf32>
    %11 = vector.shape_cast %10 : vector<1x32x64xf32> to vector<32x64xf32>
    %c0_14 = arith.constant 0 : index
    %c0_15 = arith.constant 0 : index
    %c0_16 = arith.constant 0 : index
    %12 = vector.load %arg6[%c0_14, %c0_15, %c0_16] : memref<2x64x32xf32, #tpu.memory_space<vmem>>, vector<1x64x32xf32>
    %13 = vector.shape_cast %12 : vector<1x64x32xf32> to vector<64x32xf32>
    %c0_17 = arith.constant 0 : index
    %c0_18 = arith.constant 0 : index
    %c0_19 = arith.constant 0 : index
    %14 = vector.load %arg7[%c0_17, %c0_18, %c0_19] : memref<2x8x192xf32, #tpu.memory_space<vmem>>, vector<1x8x192xf32>
    %15 = vector.shape_cast %14 : vector<1x8x192xf32> to vector<8x192xf32>
    %16 = vector.extract_strided_slice %15 {offsets = [0, 0], sizes = [1, 192], strides = [1, 1]} : vector<8x192xf32> to vector<1x192xf32>
    %17 = vector.extract_strided_slice %15 {offsets = [1, 0], sizes = [1, 32], strides = [1, 1]} : vector<8x192xf32> to vector<1x32xf32>
    %18 = vector.extract_strided_slice %15 {offsets = [2, 0], sizes = [1, 32], strides = [1, 1]} : vector<8x192xf32> to vector<1x32xf32>
    %19 = vector.extract_strided_slice %15 {offsets = [3, 0], sizes = [1, 32], strides = [1, 1]} : vector<8x192xf32> to vector<1x32xf32>
    %20 = vector.extract_strided_slice %15 {offsets = [4, 0], sizes = [1, 64], strides = [1, 1]} : vector<8x192xf32> to vector<1x64xf32>
    %21 = vector.extract_strided_slice %15 {offsets = [5, 0], sizes = [1, 32], strides = [1, 1]} : vector<8x192xf32> to vector<1x32xf32>
    %22 = vector.extract_strided_slice %15 {offsets = [6, 0], sizes = [1, 32], strides = [1, 1]} : vector<8x192xf32> to vector<1x32xf32>
    %23 = vector.extract_strided_slice %15 {offsets = [7, 0], sizes = [1, 32], strides = [1, 1]} : vector<8x192xf32> to vector<1x32xf32>
    %cst = arith.constant dense<0.000000e+00> : vector<8x192xf32>
    %24 = tpu.matmul %1, %7, %cst {dimension_numbers = #tpu.dot_dimension_numbers<[1], [0], [0], [1], [0, 0, 1, 1], [], []>} : vector<8x32xf32>, vector<32x192xf32>, vector<8x192xf32> -> vector<8x192xf32>
    %25 = vector.broadcast %16 : vector<1x192xf32> to vector<8x192xf32>
    %26 = arith.addf %24, %25 : vector<8x192xf32>
    %27 = vector.extract_strided_slice %26 {offsets = [0, 0], sizes = [8, 16], strides = [1, 1]} : vector<8x192xf32> to vector<8x16xf32>
    %28 = vector.extract_strided_slice %26 {offsets = [0, 16], sizes = [8, 16], strides = [1, 1]} : vector<8x192xf32> to vector<8x16xf32>
    %29 = vector.extract_strided_slice %26 {offsets = [0, 32], sizes = [8, 16], strides = [1, 1]} : vector<8x192xf32> to vector<8x16xf32>
    %cst_20 = arith.constant dense<0.000000e+00> : vector<8x8xf32>
    %30 = tpu.matmul %27, %28, %cst_20 {dimension_numbers = #tpu.dot_dimension_numbers<[1], [1], [0], [0], [0, 0, 1, 0], [], []>} : vector<8x16xf32>, vector<8x16xf32>, vector<8x8xf32> -> vector<8x8xf32>
    %cst_21 = arith.constant 2.500000e-01 : f32
    %31 = vector.broadcast %cst_21 : f32 to vector<8x8xf32>
    %32 = arith.mulf %30, %31 : vector<8x8xf32>
    %33 = arith.addf %32, %5 : vector<8x8xf32>
    %cst_22 = arith.constant dense<0xFF800000> : vector<8xf32>
    %34 = vector.multi_reduction <maximumf>, %33, %cst_22 [1] : vector<8x8xf32> to vector<8xf32>
    %35 = vector.shape_cast %34 : vector<8xf32> to vector<8x1xf32>
    %36 = vector.broadcast %35 : vector<8x1xf32> to vector<8x8xf32>
    %37 = arith.subf %33, %36 : vector<8x8xf32>
    %38 = math.exp %37 : vector<8x8xf32>
    %cst_23 = arith.constant dense<0.000000e+00> : vector<8xf32>
    %39 = vector.multi_reduction <add>, %38, %cst_23 [1] : vector<8x8xf32> to vector<8xf32>
    %40 = vector.shape_cast %39 : vector<8xf32> to vector<8x1xf32>
    %41 = vector.broadcast %40 : vector<8x1xf32> to vector<8x8xf32>
    %42 = arith.divf %38, %41 : vector<8x8xf32>
    %cst_24 = arith.constant dense<0.000000e+00> : vector<8x16xf32>
    %43 = tpu.matmul %42, %29, %cst_24 {dimension_numbers = #tpu.dot_dimension_numbers<[1], [0], [0], [1], [0, 0, 1, 1], [], []>} : vector<8x8xf32>, vector<8x16xf32>, vector<8x16xf32> -> vector<8x16xf32>
    %44 = vector.extract_strided_slice %26 {offsets = [0, 48], sizes = [8, 16], strides = [1, 1]} : vector<8x192xf32> to vector<8x16xf32>
    %45 = vector.extract_strided_slice %26 {offsets = [0, 64], sizes = [8, 16], strides = [1, 1]} : vector<8x192xf32> to vector<8x16xf32>
    %46 = vector.extract_strided_slice %26 {offsets = [0, 80], sizes = [8, 16], strides = [1, 1]} : vector<8x192xf32> to vector<8x16xf32>
    %cst_25 = arith.constant dense<0.000000e+00> : vector<8x8xf32>
    %47 = tpu.matmul %44, %45, %cst_25 {dimension_numbers = #tpu.dot_dimension_numbers<[1], [1], [0], [0], [0, 0, 1, 0], [], []>} : vector<8x16xf32>, vector<8x16xf32>, vector<8x8xf32> -> vector<8x8xf32>
    %cst_26 = arith.constant 2.500000e-01 : f32
    %48 = vector.broadcast %cst_26 : f32 to vector<8x8xf32>
    %49 = arith.mulf %47, %48 : vector<8x8xf32>
    %50 = arith.addf %49, %5 : vector<8x8xf32>
    %cst_27 = arith.constant dense<0xFF800000> : vector<8xf32>
    %51 = vector.multi_reduction <maximumf>, %50, %cst_27 [1] : vector<8x8xf32> to vector<8xf32>
    %52 = vector.shape_cast %51 : vector<8xf32> to vector<8x1xf32>
    %53 = vector.broadcast %52 : vector<8x1xf32> to vector<8x8xf32>
    %54 = arith.subf %50, %53 : vector<8x8xf32>
    %55 = math.exp %54 : vector<8x8xf32>
    %cst_28 = arith.constant dense<0.000000e+00> : vector<8xf32>
    %56 = vector.multi_reduction <add>, %55, %cst_28 [1] : vector<8x8xf32> to vector<8xf32>
    %57 = vector.shape_cast %56 : vector<8xf32> to vector<8x1xf32>
    %58 = vector.broadcast %57 : vector<8x1xf32> to vector<8x8xf32>
    %59 = arith.divf %55, %58 : vector<8x8xf32>
    %cst_29 = arith.constant dense<0.000000e+00> : vector<8x16xf32>
    %60 = tpu.matmul %59, %46, %cst_29 {dimension_numbers = #tpu.dot_dimension_numbers<[1], [0], [0], [1], [0, 0, 1, 1], [], []>} : vector<8x8xf32>, vector<8x16xf32>, vector<8x16xf32> -> vector<8x16xf32>
    %61 = vector.extract_strided_slice %26 {offsets = [0, 96], sizes = [8, 16], strides = [1, 1]} : vector<8x192xf32> to vector<8x16xf32>
    %62 = vector.extract_strided_slice %26 {offsets = [0, 112], sizes = [8, 16], strides = [1, 1]} : vector<8x192xf32> to vector<8x16xf32>
    %63 = vector.extract_strided_slice %26 {offsets = [0, 128], sizes = [8, 16], strides = [1, 1]} : vector<8x192xf32> to vector<8x16xf32>
    %cst_30 = arith.constant dense<0.000000e+00> : vector<8x8xf32>
    %64 = tpu.matmul %61, %62, %cst_30 {dimension_numbers = #tpu.dot_dimension_numbers<[1], [1], [0], [0], [0, 0, 1, 0], [], []>} : vector<8x16xf32>, vector<8x16xf32>, vector<8x8xf32> -> vector<8x8xf32>
    %cst_31 = arith.constant 2.500000e-01 : f32
    %65 = vector.broadcast %cst_31 : f32 to vector<8x8xf32>
    %66 = arith.mulf %64, %65 : vector<8x8xf32>
    %67 = arith.addf %66, %5 : vector<8x8xf32>
    %cst_32 = arith.constant dense<0xFF800000> : vector<8xf32>
    %68 = vector.multi_reduction <maximumf>, %67, %cst_32 [1] : vector<8x8xf32> to vector<8xf32>
    %69 = vector.shape_cast %68 : vector<8xf32> to vector<8x1xf32>
    %70 = vector.broadcast %69 : vector<8x1xf32> to vector<8x8xf32>
    %71 = arith.subf %67, %70 : vector<8x8xf32>
    %72 = math.exp %71 : vector<8x8xf32>
    %cst_33 = arith.constant dense<0.000000e+00> : vector<8xf32>
    %73 = vector.multi_reduction <add>, %72, %cst_33 [1] : vector<8x8xf32> to vector<8xf32>
    %74 = vector.shape_cast %73 : vector<8xf32> to vector<8x1xf32>
    %75 = vector.broadcast %74 : vector<8x1xf32> to vector<8x8xf32>
    %76 = arith.divf %72, %75 : vector<8x8xf32>
    %cst_34 = arith.constant dense<0.000000e+00> : vector<8x16xf32>
    %77 = tpu.matmul %76, %63, %cst_34 {dimension_numbers = #tpu.dot_dimension_numbers<[1], [0], [0], [1], [0, 0, 1, 1], [], []>} : vector<8x8xf32>, vector<8x16xf32>, vector<8x16xf32> -> vector<8x16xf32>
    %78 = vector.extract_strided_slice %26 {offsets = [0, 144], sizes = [8, 16], strides = [1, 1]} : vector<8x192xf32> to vector<8x16xf32>
    %79 = vector.extract_strided_slice %26 {offsets = [0, 160], sizes = [8, 16], strides = [1, 1]} : vector<8x192xf32> to vector<8x16xf32>
    %80 = vector.extract_strided_slice %26 {offsets = [0, 176], sizes = [8, 16], strides = [1, 1]} : vector<8x192xf32> to vector<8x16xf32>
    %cst_35 = arith.constant dense<0.000000e+00> : vector<8x8xf32>
    %81 = tpu.matmul %78, %79, %cst_35 {dimension_numbers = #tpu.dot_dimension_numbers<[1], [1], [0], [0], [0, 0, 1, 0], [], []>} : vector<8x16xf32>, vector<8x16xf32>, vector<8x8xf32> -> vector<8x8xf32>
    %cst_36 = arith.constant 2.500000e-01 : f32
    %82 = vector.broadcast %cst_36 : f32 to vector<8x8xf32>
    %83 = arith.mulf %81, %82 : vector<8x8xf32>
    %84 = arith.addf %83, %5 : vector<8x8xf32>
    %cst_37 = arith.constant dense<0xFF800000> : vector<8xf32>
    %85 = vector.multi_reduction <maximumf>, %84, %cst_37 [1] : vector<8x8xf32> to vector<8xf32>
    %86 = vector.shape_cast %85 : vector<8xf32> to vector<8x1xf32>
    %87 = vector.broadcast %86 : vector<8x1xf32> to vector<8x8xf32>
    %88 = arith.subf %84, %87 : vector<8x8xf32>
    %89 = math.exp %88 : vector<8x8xf32>
    %cst_38 = arith.constant dense<0.000000e+00> : vector<8xf32>
    %90 = vector.multi_reduction <add>, %89, %cst_38 [1] : vector<8x8xf32> to vector<8xf32>
    %91 = vector.shape_cast %90 : vector<8xf32> to vector<8x1xf32>
    %92 = vector.broadcast %91 : vector<8x1xf32> to vector<8x8xf32>
    %93 = arith.divf %89, %92 : vector<8x8xf32>
    %cst_39 = arith.constant dense<0.000000e+00> : vector<8x16xf32>
    %94 = tpu.matmul %93, %80, %cst_39 {dimension_numbers = #tpu.dot_dimension_numbers<[1], [0], [0], [1], [0, 0, 1, 1], [], []>} : vector<8x8xf32>, vector<8x16xf32>, vector<8x16xf32> -> vector<8x16xf32>
    %95 = tpu.concatenate %43, %60, %77, %94 in 1 : vector<8x16xf32>, vector<8x16xf32>, vector<8x16xf32>, vector<8x16xf32> -> vector<8x64xf32>
    %96 = tpu.concatenate %42, %59, %76, %93 in 0 : vector<8x8xf32>, vector<8x8xf32>, vector<8x8xf32>, vector<8x8xf32> -> vector<32x8xf32>
    %cst_40 = arith.constant dense<0.000000e+00> : vector<8x32xf32>
    %97 = tpu.matmul %95, %9, %cst_40 {dimension_numbers = #tpu.dot_dimension_numbers<[1], [0], [0], [1], [0, 0, 1, 1], [], []>} : vector<8x64xf32>, vector<64x32xf32>, vector<8x32xf32> -> vector<8x32xf32>
    %98 = vector.broadcast %17 : vector<1x32xf32> to vector<8x32xf32>
    %99 = arith.addf %97, %98 : vector<8x32xf32>
    %100 = arith.addf %99, %1 : vector<8x32xf32>
    %cst_41 = arith.constant dense<0.000000e+00> : vector<8xf32>
    %101 = vector.multi_reduction <add>, %100, %cst_41 [1] : vector<8x32xf32> to vector<8xf32>
    %102 = vector.shape_cast %101 : vector<8xf32> to vector<8x1xf32>
    %cst_42 = arith.constant 3.200000e+01 : f32
    %103 = vector.broadcast %cst_42 : f32 to vector<8x1xf32>
    %104 = arith.divf %102, %103 : vector<8x1xf32>
    %105 = vector.broadcast %104 : vector<8x1xf32> to vector<8x32xf32>
    %106 = arith.subf %100, %105 : vector<8x32xf32>
    %107 = arith.mulf %106, %106 : vector<8x32xf32>
    %cst_43 = arith.constant dense<0.000000e+00> : vector<8xf32>
    %108 = vector.multi_reduction <add>, %107, %cst_43 [1] : vector<8x32xf32> to vector<8xf32>
    %109 = vector.shape_cast %108 : vector<8xf32> to vector<8x1xf32>
    %cst_44 = arith.constant 3.200000e+01 : f32
    %110 = vector.broadcast %cst_44 : f32 to vector<8x1xf32>
    %111 = arith.divf %109, %110 : vector<8x1xf32>
    %112 = vector.broadcast %104 : vector<8x1xf32> to vector<8x32xf32>
    %113 = arith.subf %100, %112 : vector<8x32xf32>
    %cst_45 = arith.constant 9.99999974E-6 : f32
    %114 = vector.broadcast %cst_45 : f32 to vector<8x1xf32>
    %115 = arith.addf %111, %114 : vector<8x1xf32>
    %116 = math.rsqrt %115 : vector<8x1xf32>
    %117 = vector.broadcast %116 : vector<8x1xf32> to vector<8x32xf32>
    %118 = arith.mulf %113, %117 : vector<8x32xf32>
    %119 = vector.broadcast %18 : vector<1x32xf32> to vector<8x32xf32>
    %120 = arith.mulf %118, %119 : vector<8x32xf32>
    %121 = vector.broadcast %19 : vector<1x32xf32> to vector<8x32xf32>
    %122 = arith.addf %120, %121 : vector<8x32xf32>
    %cst_46 = arith.constant dense<0.000000e+00> : vector<8x64xf32>
    %123 = tpu.matmul %122, %11, %cst_46 {dimension_numbers = #tpu.dot_dimension_numbers<[1], [0], [0], [1], [0, 0, 1, 1], [], []>} : vector<8x32xf32>, vector<32x64xf32>, vector<8x64xf32> -> vector<8x64xf32>
    %124 = vector.broadcast %20 : vector<1x64xf32> to vector<8x64xf32>
    %125 = arith.addf %123, %124 : vector<8x64xf32>
    %cst_47 = arith.constant 0.000000e+00 : f32
    %126 = vector.broadcast %cst_47 : f32 to vector<8x64xf32>
    %127 = arith.maximumf %125, %126 : vector<8x64xf32>
    %cst_48 = arith.constant dense<0.000000e+00> : vector<8x32xf32>
    %128 = tpu.matmul %127, %13, %cst_48 {dimension_numbers = #tpu.dot_dimension_numbers<[1], [0], [0], [1], [0, 0, 1, 1], [], []>} : vector<8x64xf32>, vector<64x32xf32>, vector<8x32xf32> -> vector<8x32xf32>
    %129 = vector.broadcast %21 : vector<1x32xf32> to vector<8x32xf32>
    %130 = arith.addf %128, %129 : vector<8x32xf32>
    %131 = arith.addf %130, %122 : vector<8x32xf32>
    %cst_49 = arith.constant dense<0.000000e+00> : vector<8xf32>
    %132 = vector.multi_reduction <add>, %131, %cst_49 [1] : vector<8x32xf32> to vector<8xf32>
    %133 = vector.shape_cast %132 : vector<8xf32> to vector<8x1xf32>
    %cst_50 = arith.constant 3.200000e+01 : f32
    %134 = vector.broadcast %cst_50 : f32 to vector<8x1xf32>
    %135 = arith.divf %133, %134 : vector<8x1xf32>
    %136 = vector.broadcast %135 : vector<8x1xf32> to vector<8x32xf32>
    %137 = arith.subf %131, %136 : vector<8x32xf32>
    %138 = arith.mulf %137, %137 : vector<8x32xf32>
    %cst_51 = arith.constant dense<0.000000e+00> : vector<8xf32>
    %139 = vector.multi_reduction <add>, %138, %cst_51 [1] : vector<8x32xf32> to vector<8xf32>
    %140 = vector.shape_cast %139 : vector<8xf32> to vector<8x1xf32>
    %cst_52 = arith.constant 3.200000e+01 : f32
    %141 = vector.broadcast %cst_52 : f32 to vector<8x1xf32>
    %142 = arith.divf %140, %141 : vector<8x1xf32>
    %143 = vector.broadcast %135 : vector<8x1xf32> to vector<8x32xf32>
    %144 = arith.subf %131, %143 : vector<8x32xf32>
    %cst_53 = arith.constant 9.99999974E-6 : f32
    %145 = vector.broadcast %cst_53 : f32 to vector<8x1xf32>
    %146 = arith.addf %142, %145 : vector<8x1xf32>
    %147 = math.rsqrt %146 : vector<8x1xf32>
    %148 = vector.broadcast %147 : vector<8x1xf32> to vector<8x32xf32>
    %149 = arith.mulf %144, %148 : vector<8x32xf32>
    %150 = vector.broadcast %22 : vector<1x32xf32> to vector<8x32xf32>
    %151 = arith.mulf %149, %150 : vector<8x32xf32>
    %152 = vector.broadcast %23 : vector<1x32xf32> to vector<8x32xf32>
    %153 = arith.addf %151, %152 : vector<8x32xf32>
    %c0_54 = arith.constant 0 : index
    %c0_55 = arith.constant 0 : index
    %c0_56 = arith.constant 0 : index
    %c0_57 = arith.constant 0 : index
    %154 = vector.load %arg9[%c0_54, %c0_55, %c0_56, %c0_57] : memref<1x2x32x8xf32, #tpu.memory_space<vmem>>, vector<1x1x32x8xf32>
    %155 = vector.shape_cast %154 : vector<1x1x32x8xf32> to vector<32x8xf32>
    %156 = vector.shape_cast %96 : vector<32x8xf32> to vector<1x1x32x8xf32>
    tpu.vector_store %arg9[%c0_54, %c0_55, %c0_56, %c0_57], %156 {strides = array<i32>} : memref<1x2x32x8xf32, #tpu.memory_space<vmem>>, vector<1x1x32x8xf32>,
    %c1 = arith.constant 1 : index
    %c0_58 = arith.constant 0 : index
    %c0_59 = arith.constant 0 : index
    %157 = vector.load %arg3[%c1, %c0_58, %c0_59] : memref<2x32x192xf32, #tpu.memory_space<vmem>>, vector<1x32x192xf32>
    %158 = vector.shape_cast %157 : vector<1x32x192xf32> to vector<32x192xf32>
    %c1_60 = arith.constant 1 : index
    %c0_61 = arith.constant 0 : index
    %c0_62 = arith.constant 0 : index
    %159 = vector.load %arg4[%c1_60, %c0_61, %c0_62] : memref<2x64x32xf32, #tpu.memory_space<vmem>>, vector<1x64x32xf32>
    %160 = vector.shape_cast %159 : vector<1x64x32xf32> to vector<64x32xf32>
    %c1_63 = arith.constant 1 : index
    %c0_64 = arith.constant 0 : index
    %c0_65 = arith.constant 0 : index
    %161 = vector.load %arg5[%c1_63, %c0_64, %c0_65] : memref<2x32x64xf32, #tpu.memory_space<vmem>>, vector<1x32x64xf32>
    %162 = vector.shape_cast %161 : vector<1x32x64xf32> to vector<32x64xf32>
    %c1_66 = arith.constant 1 : index
    %c0_67 = arith.constant 0 : index
    %c0_68 = arith.constant 0 : index
    %163 = vector.load %arg6[%c1_66, %c0_67, %c0_68] : memref<2x64x32xf32, #tpu.memory_space<vmem>>, vector<1x64x32xf32>
    %164 = vector.shape_cast %163 : vector<1x64x32xf32> to vector<64x32xf32>
    %c1_69 = arith.constant 1 : index
    %c0_70 = arith.constant 0 : index
    %c0_71 = arith.constant 0 : index
    %165 = vector.load %arg7[%c1_69, %c0_70, %c0_71] : memref<2x8x192xf32, #tpu.memory_space<vmem>>, vector<1x8x192xf32>
    %166 = vector.shape_cast %165 : vector<1x8x192xf32> to vector<8x192xf32>
    %167 = vector.extract_strided_slice %166 {offsets = [0, 0], sizes = [1, 192], strides = [1, 1]} : vector<8x192xf32> to vector<1x192xf32>
    %168 = vector.extract_strided_slice %166 {offsets = [1, 0], sizes = [1, 32], strides = [1, 1]} : vector<8x192xf32> to vector<1x32xf32>
    %169 = vector.extract_strided_slice %166 {offsets = [2, 0], sizes = [1, 32], strides = [1, 1]} : vector<8x192xf32> to vector<1x32xf32>
    %170 = vector.extract_strided_slice %166 {offsets = [3, 0], sizes = [1, 32], strides = [1, 1]} : vector<8x192xf32> to vector<1x32xf32>
    %171 = vector.extract_strided_slice %166 {offsets = [4, 0], sizes = [1, 64], strides = [1, 1]} : vector<8x192xf32> to vector<1x64xf32>
    %172 = vector.extract_strided_slice %166 {offsets = [5, 0], sizes = [1, 32], strides = [1, 1]} : vector<8x192xf32> to vector<1x32xf32>
    %173 = vector.extract_strided_slice %166 {offsets = [6, 0], sizes = [1, 32], strides = [1, 1]} : vector<8x192xf32> to vector<1x32xf32>
    %174 = vector.extract_strided_slice %166 {offsets = [7, 0], sizes = [1, 32], strides = [1, 1]} : vector<8x192xf32> to vector<1x32xf32>
    %cst_72 = arith.constant dense<0.000000e+00> : vector<8x192xf32>
    %175 = tpu.matmul %153, %158, %cst_72 {dimension_numbers = #tpu.dot_dimension_numbers<[1], [0], [0], [1], [0, 0, 1, 1], [], []>} : vector<8x32xf32>, vector<32x192xf32>, vector<8x192xf32> -> vector<8x192xf32>
    %176 = vector.broadcast %167 : vector<1x192xf32> to vector<8x192xf32>
    %177 = arith.addf %175, %176 : vector<8x192xf32>
    %178 = vector.extract_strided_slice %177 {offsets = [0, 0], sizes = [8, 16], strides = [1, 1]} : vector<8x192xf32> to vector<8x16xf32>
    %179 = vector.extract_strided_slice %177 {offsets = [0, 16], sizes = [8, 16], strides = [1, 1]} : vector<8x192xf32> to vector<8x16xf32>
    %180 = vector.extract_strided_slice %177 {offsets = [0, 32], sizes = [8, 16], strides = [1, 1]} : vector<8x192xf32> to vector<8x16xf32>
    %cst_73 = arith.constant dense<0.000000e+00> : vector<8x8xf32>
    %181 = tpu.matmul %178, %179, %cst_73 {dimension_numbers = #tpu.dot_dimension_numbers<[1], [1], [0], [0], [0, 0, 1, 0], [], []>} : vector<8x16xf32>, vector<8x16xf32>, vector<8x8xf32> -> vector<8x8xf32>
    %cst_74 = arith.constant 2.500000e-01 : f32
    %182 = vector.broadcast %cst_74 : f32 to vector<8x8xf32>
    %183 = arith.mulf %181, %182 : vector<8x8xf32>
    %184 = arith.addf %183, %5 : vector<8x8xf32>
    %cst_75 = arith.constant dense<0xFF800000> : vector<8xf32>
    %185 = vector.multi_reduction <maximumf>, %184, %cst_75 [1] : vector<8x8xf32> to vector<8xf32>
    %186 = vector.shape_cast %185 : vector<8xf32> to vector<8x1xf32>
    %187 = vector.broadcast %186 : vector<8x1xf32> to vector<8x8xf32>
    %188 = arith.subf %184, %187 : vector<8x8xf32>
    %189 = math.exp %188 : vector<8x8xf32>
    %cst_76 = arith.constant dense<0.000000e+00> : vector<8xf32>
    %190 = vector.multi_reduction <add>, %189, %cst_76 [1] : vector<8x8xf32> to vector<8xf32>
    %191 = vector.shape_cast %190 : vector<8xf32> to vector<8x1xf32>
    %192 = vector.broadcast %191 : vector<8x1xf32> to vector<8x8xf32>
    %193 = arith.divf %189, %192 : vector<8x8xf32>
    %cst_77 = arith.constant dense<0.000000e+00> : vector<8x16xf32>
    %194 = tpu.matmul %193, %180, %cst_77 {dimension_numbers = #tpu.dot_dimension_numbers<[1], [0], [0], [1], [0, 0, 1, 1], [], []>} : vector<8x8xf32>, vector<8x16xf32>, vector<8x16xf32> -> vector<8x16xf32>
    %195 = vector.extract_strided_slice %177 {offsets = [0, 48], sizes = [8, 16], strides = [1, 1]} : vector<8x192xf32> to vector<8x16xf32>
    %196 = vector.extract_strided_slice %177 {offsets = [0, 64], sizes = [8, 16], strides = [1, 1]} : vector<8x192xf32> to vector<8x16xf32>
    %197 = vector.extract_strided_slice %177 {offsets = [0, 80], sizes = [8, 16], strides = [1, 1]} : vector<8x192xf32> to vector<8x16xf32>
    %cst_78 = arith.constant dense<0.000000e+00> : vector<8x8xf32>
    %198 = tpu.matmul %195, %196, %cst_78 {dimension_numbers = #tpu.dot_dimension_numbers<[1], [1], [0], [0], [0, 0, 1, 0], [], []>} : vector<8x16xf32>, vector<8x16xf32>, vector<8x8xf32> -> vector<8x8xf32>
    %cst_79 = arith.constant 2.500000e-01 : f32
    %199 = vector.broadcast %cst_79 : f32 to vector<8x8xf32>
    %200 = arith.mulf %198, %199 : vector<8x8xf32>
    %201 = arith.addf %200, %5 : vector<8x8xf32>
    %cst_80 = arith.constant dense<0xFF800000> : vector<8xf32>
    %202 = vector.multi_reduction <maximumf>, %201, %cst_80 [1] : vector<8x8xf32> to vector<8xf32>
    %203 = vector.shape_cast %202 : vector<8xf32> to vector<8x1xf32>
    %204 = vector.broadcast %203 : vector<8x1xf32> to vector<8x8xf32>
    %205 = arith.subf %201, %204 : vector<8x8xf32>
    %206 = math.exp %205 : vector<8x8xf32>
    %cst_81 = arith.constant dense<0.000000e+00> : vector<8xf32>
    %207 = vector.multi_reduction <add>, %206, %cst_81 [1] : vector<8x8xf32> to vector<8xf32>
    %208 = vector.shape_cast %207 : vector<8xf32> to vector<8x1xf32>
    %209 = vector.broadcast %208 : vector<8x1xf32> to vector<8x8xf32>
    %210 = arith.divf %206, %209 : vector<8x8xf32>
    %cst_82 = arith.constant dense<0.000000e+00> : vector<8x16xf32>
    %211 = tpu.matmul %210, %197, %cst_82 {dimension_numbers = #tpu.dot_dimension_numbers<[1], [0], [0], [1], [0, 0, 1, 1], [], []>} : vector<8x8xf32>, vector<8x16xf32>, vector<8x16xf32> -> vector<8x16xf32>
    %212 = vector.extract_strided_slice %177 {offsets = [0, 96], sizes = [8, 16], strides = [1, 1]} : vector<8x192xf32> to vector<8x16xf32>
    %213 = vector.extract_strided_slice %177 {offsets = [0, 112], sizes = [8, 16], strides = [1, 1]} : vector<8x192xf32> to vector<8x16xf32>
    %214 = vector.extract_strided_slice %177 {offsets = [0, 128], sizes = [8, 16], strides = [1, 1]} : vector<8x192xf32> to vector<8x16xf32>
    %cst_83 = arith.constant dense<0.000000e+00> : vector<8x8xf32>
    %215 = tpu.matmul %212, %213, %cst_83 {dimension_numbers = #tpu.dot_dimension_numbers<[1], [1], [0], [0], [0, 0, 1, 0], [], []>} : vector<8x16xf32>, vector<8x16xf32>, vector<8x8xf32> -> vector<8x8xf32>
    %cst_84 = arith.constant 2.500000e-01 : f32
    %216 = vector.broadcast %cst_84 : f32 to vector<8x8xf32>
    %217 = arith.mulf %215, %216 : vector<8x8xf32>
    %218 = arith.addf %217, %5 : vector<8x8xf32>
    %cst_85 = arith.constant dense<0xFF800000> : vector<8xf32>
    %219 = vector.multi_reduction <maximumf>, %218, %cst_85 [1] : vector<8x8xf32> to vector<8xf32>
    %220 = vector.shape_cast %219 : vector<8xf32> to vector<8x1xf32>
    %221 = vector.broadcast %220 : vector<8x1xf32> to vector<8x8xf32>
    %222 = arith.subf %218, %221 : vector<8x8xf32>
    %223 = math.exp %222 : vector<8x8xf32>
    %cst_86 = arith.constant dense<0.000000e+00> : vector<8xf32>
    %224 = vector.multi_reduction <add>, %223, %cst_86 [1] : vector<8x8xf32> to vector<8xf32>
    %225 = vector.shape_cast %224 : vector<8xf32> to vector<8x1xf32>
    %226 = vector.broadcast %225 : vector<8x1xf32> to vector<8x8xf32>
    %227 = arith.divf %223, %226 : vector<8x8xf32>
    %cst_87 = arith.constant dense<0.000000e+00> : vector<8x16xf32>
    %228 = tpu.matmul %227, %214, %cst_87 {dimension_numbers = #tpu.dot_dimension_numbers<[1], [0], [0], [1], [0, 0, 1, 1], [], []>} : vector<8x8xf32>, vector<8x16xf32>, vector<8x16xf32> -> vector<8x16xf32>
    %229 = vector.extract_strided_slice %177 {offsets = [0, 144], sizes = [8, 16], strides = [1, 1]} : vector<8x192xf32> to vector<8x16xf32>
    %230 = vector.extract_strided_slice %177 {offsets = [0, 160], sizes = [8, 16], strides = [1, 1]} : vector<8x192xf32> to vector<8x16xf32>
    %231 = vector.extract_strided_slice %177 {offsets = [0, 176], sizes = [8, 16], strides = [1, 1]} : vector<8x192xf32> to vector<8x16xf32>
    %cst_88 = arith.constant dense<0.000000e+00> : vector<8x8xf32>
    %232 = tpu.matmul %229, %230, %cst_88 {dimension_numbers = #tpu.dot_dimension_numbers<[1], [1], [0], [0], [0, 0, 1, 0], [], []>} : vector<8x16xf32>, vector<8x16xf32>, vector<8x8xf32> -> vector<8x8xf32>
    %cst_89 = arith.constant 2.500000e-01 : f32
    %233 = vector.broadcast %cst_89 : f32 to vector<8x8xf32>
    %234 = arith.mulf %232, %233 : vector<8x8xf32>
    %235 = arith.addf %234, %5 : vector<8x8xf32>
    %cst_90 = arith.constant dense<0xFF800000> : vector<8xf32>
    %236 = vector.multi_reduction <maximumf>, %235, %cst_90 [1] : vector<8x8xf32> to vector<8xf32>
    %237 = vector.shape_cast %236 : vector<8xf32> to vector<8x1xf32>
    %238 = vector.broadcast %237 : vector<8x1xf32> to vector<8x8xf32>
    %239 = arith.subf %235, %238 : vector<8x8xf32>
    %240 = math.exp %239 : vector<8x8xf32>
    %cst_91 = arith.constant dense<0.000000e+00> : vector<8xf32>
    %241 = vector.multi_reduction <add>, %240, %cst_91 [1] : vector<8x8xf32> to vector<8xf32>
    %242 = vector.shape_cast %241 : vector<8xf32> to vector<8x1xf32>
    %243 = vector.broadcast %242 : vector<8x1xf32> to vector<8x8xf32>
    %244 = arith.divf %240, %243 : vector<8x8xf32>
    %cst_92 = arith.constant dense<0.000000e+00> : vector<8x16xf32>
    %245 = tpu.matmul %244, %231, %cst_92 {dimension_numbers = #tpu.dot_dimension_numbers<[1], [0], [0], [1], [0, 0, 1, 1], [], []>} : vector<8x8xf32>, vector<8x16xf32>, vector<8x16xf32> -> vector<8x16xf32>
    %246 = tpu.concatenate %194, %211, %228, %245 in 1 : vector<8x16xf32>, vector<8x16xf32>, vector<8x16xf32>, vector<8x16xf32> -> vector<8x64xf32>
    %247 = tpu.concatenate %193, %210, %227, %244 in 0 : vector<8x8xf32>, vector<8x8xf32>, vector<8x8xf32>, vector<8x8xf32> -> vector<32x8xf32>
    %cst_93 = arith.constant dense<0.000000e+00> : vector<8x32xf32>
    %248 = tpu.matmul %246, %160, %cst_93 {dimension_numbers = #tpu.dot_dimension_numbers<[1], [0], [0], [1], [0, 0, 1, 1], [], []>} : vector<8x64xf32>, vector<64x32xf32>, vector<8x32xf32> -> vector<8x32xf32>
    %249 = vector.broadcast %168 : vector<1x32xf32> to vector<8x32xf32>
    %250 = arith.addf %248, %249 : vector<8x32xf32>
    %251 = arith.addf %250, %153 : vector<8x32xf32>
    %cst_94 = arith.constant dense<0.000000e+00> : vector<8xf32>
    %252 = vector.multi_reduction <add>, %251, %cst_94 [1] : vector<8x32xf32> to vector<8xf32>
    %253 = vector.shape_cast %252 : vector<8xf32> to vector<8x1xf32>
    %cst_95 = arith.constant 3.200000e+01 : f32
    %254 = vector.broadcast %cst_95 : f32 to vector<8x1xf32>
    %255 = arith.divf %253, %254 : vector<8x1xf32>
    %256 = vector.broadcast %255 : vector<8x1xf32> to vector<8x32xf32>
    %257 = arith.subf %251, %256 : vector<8x32xf32>
    %258 = arith.mulf %257, %257 : vector<8x32xf32>
    %cst_96 = arith.constant dense<0.000000e+00> : vector<8xf32>
    %259 = vector.multi_reduction <add>, %258, %cst_96 [1] : vector<8x32xf32> to vector<8xf32>
    %260 = vector.shape_cast %259 : vector<8xf32> to vector<8x1xf32>
    %cst_97 = arith.constant 3.200000e+01 : f32
    %261 = vector.broadcast %cst_97 : f32 to vector<8x1xf32>
    %262 = arith.divf %260, %261 : vector<8x1xf32>
    %263 = vector.broadcast %255 : vector<8x1xf32> to vector<8x32xf32>
    %264 = arith.subf %251, %263 : vector<8x32xf32>
    %cst_98 = arith.constant 9.99999974E-6 : f32
    %265 = vector.broadcast %cst_98 : f32 to vector<8x1xf32>
    %266 = arith.addf %262, %265 : vector<8x1xf32>
    %267 = math.rsqrt %266 : vector<8x1xf32>
    %268 = vector.broadcast %267 : vector<8x1xf32> to vector<8x32xf32>
    %269 = arith.mulf %264, %268 : vector<8x32xf32>
    %270 = vector.broadcast %169 : vector<1x32xf32> to vector<8x32xf32>
    %271 = arith.mulf %269, %270 : vector<8x32xf32>
    %272 = vector.broadcast %170 : vector<1x32xf32> to vector<8x32xf32>
    %273 = arith.addf %271, %272 : vector<8x32xf32>
    %cst_99 = arith.constant dense<0.000000e+00> : vector<8x64xf32>
    %274 = tpu.matmul %273, %162, %cst_99 {dimension_numbers = #tpu.dot_dimension_numbers<[1], [0], [0], [1], [0, 0, 1, 1], [], []>} : vector<8x32xf32>, vector<32x64xf32>, vector<8x64xf32> -> vector<8x64xf32>
    %275 = vector.broadcast %171 : vector<1x64xf32> to vector<8x64xf32>
    %276 = arith.addf %274, %275 : vector<8x64xf32>
    %cst_100 = arith.constant 0.000000e+00 : f32
    %277 = vector.broadcast %cst_100 : f32 to vector<8x64xf32>
    %278 = arith.maximumf %276, %277 : vector<8x64xf32>
    %cst_101 = arith.constant dense<0.000000e+00> : vector<8x32xf32>
    %279 = tpu.matmul %278, %164, %cst_101 {dimension_numbers = #tpu.dot_dimension_numbers<[1], [0], [0], [1], [0, 0, 1, 1], [], []>} : vector<8x64xf32>, vector<64x32xf32>, vector<8x32xf32> -> vector<8x32xf32>
    %280 = vector.broadcast %172 : vector<1x32xf32> to vector<8x32xf32>
    %281 = arith.addf %279, %280 : vector<8x32xf32>
    %282 = arith.addf %281, %273 : vector<8x32xf32>
    %cst_102 = arith.constant dense<0.000000e+00> : vector<8xf32>
    %283 = vector.multi_reduction <add>, %282, %cst_102 [1] : vector<8x32xf32> to vector<8xf32>
    %284 = vector.shape_cast %283 : vector<8xf32> to vector<8x1xf32>
    %cst_103 = arith.constant 3.200000e+01 : f32
    %285 = vector.broadcast %cst_103 : f32 to vector<8x1xf32>
    %286 = arith.divf %284, %285 : vector<8x1xf32>
    %287 = vector.broadcast %286 : vector<8x1xf32> to vector<8x32xf32>
    %288 = arith.subf %282, %287 : vector<8x32xf32>
    %289 = arith.mulf %288, %288 : vector<8x32xf32>
    %cst_104 = arith.constant dense<0.000000e+00> : vector<8xf32>
    %290 = vector.multi_reduction <add>, %289, %cst_104 [1] : vector<8x32xf32> to vector<8xf32>
    %291 = vector.shape_cast %290 : vector<8xf32> to vector<8x1xf32>
    %cst_105 = arith.constant 3.200000e+01 : f32
    %292 = vector.broadcast %cst_105 : f32 to vector<8x1xf32>
    %293 = arith.divf %291, %292 : vector<8x1xf32>
    %294 = vector.broadcast %286 : vector<8x1xf32> to vector<8x32xf32>
    %295 = arith.subf %282, %294 : vector<8x32xf32>
    %cst_106 = arith.constant 9.99999974E-6 : f32
    %296 = vector.broadcast %cst_106 : f32 to vector<8x1xf32>
    %297 = arith.addf %293, %296 : vector<8x1xf32>
    %298 = math.rsqrt %297 : vector<8x1xf32>
    %299 = vector.broadcast %298 : vector<8x1xf32> to vector<8x32xf32>
    %300 = arith.mulf %295, %299 : vector<8x32xf32>
    %301 = vector.broadcast %173 : vector<1x32xf32> to vector<8x32xf32>
    %302 = arith.mulf %300, %301 : vector<8x32xf32>
    %303 = vector.broadcast %174 : vector<1x32xf32> to vector<8x32xf32>
    %304 = arith.addf %302, %303 : vector<8x32xf32>
    %c0_107 = arith.constant 0 : index
    %c1_108 = arith.constant 1 : index
    %c0_109 = arith.constant 0 : index
    %c0_110 = arith.constant 0 : index
    %305 = vector.load %arg9[%c0_107, %c1_108, %c0_109, %c0_110] : memref<1x2x32x8xf32, #tpu.memory_space<vmem>>, vector<1x1x32x8xf32>
    %306 = vector.shape_cast %305 : vector<1x1x32x8xf32> to vector<32x8xf32>
    %307 = vector.shape_cast %247 : vector<32x8xf32> to vector<1x1x32x8xf32>
    tpu.vector_store %arg9[%c0_107, %c1_108, %c0_109, %c0_110], %307 {strides = array<i32>} : memref<1x2x32x8xf32, #tpu.memory_space<vmem>>, vector<1x1x32x8xf32>,
    %c0_111 = arith.constant 0 : index
    %c0_112 = arith.constant 0 : index
    %c0_113 = arith.constant 0 : index
    %308 = vector.load %arg8[%c0_111, %c0_112, %c0_113] : memref<1x8x32xf32, #tpu.memory_space<vmem>>, vector<1x8x32xf32>
    %309 = vector.shape_cast %308 : vector<1x8x32xf32> to vector<8x32xf32>
    %310 = vector.shape_cast %304 : vector<8x32xf32> to vector<1x8x32xf32>
    tpu.vector_store %arg8[%c0_111, %c0_112, %c0_113], %310 {strides = array<i32>} : memref<1x8x32xf32, #tpu.memory_space<vmem>>, vector<1x8x32xf32>,
    return
  }
  func.func @transform_0(%arg0: i32) -> (i32, i32, i32) {
    %c0_i32 = arith.constant 0 : i32
    %c0_i32_0 = arith.constant 0 : i32
    %c0_i32_1 = arith.constant 0 : i32
    return %arg0, %c0_i32, %c0_i32_0 : i32, i32, i32
  }
  func.func @transform_1(%arg0: i32) -> (i32, i32, i32) {
    %c0_i32 = arith.constant 0 : i32
    %c0_i32_0 = arith.constant 0 : i32
    %c0_i32_1 = arith.constant 0 : i32
    return %arg0, %c0_i32, %c0_i32_0 : i32, i32, i32
  }
  func.func @transform_2(%arg0: i32) -> (i32, i32, i32) {
    %c0_i32 = arith.constant 0 : i32
    %c0_i32_0 = arith.constant 0 : i32
    %c0_i32_1 = arith.constant 0 : i32
    %c0_i32_2 = arith.constant 0 : i32
    return %c0_i32, %c0_i32_0, %c0_i32_1 : i32, i32, i32
  }
  func.func @transform_3(%arg0: i32) -> (i32, i32, i32) {
    %c0_i32 = arith.constant 0 : i32
    %c0_i32_0 = arith.constant 0 : i32
    %c0_i32_1 = arith.constant 0 : i32
    %c0_i32_2 = arith.constant 0 : i32
    return %c0_i32, %c0_i32_0, %c0_i32_1 : i32, i32, i32
  }
  func.func @transform_4(%arg0: i32) -> (i32, i32, i32) {
    %c0_i32 = arith.constant 0 : i32
    %c0_i32_0 = arith.constant 0 : i32
    %c0_i32_1 = arith.constant 0 : i32
    %c0_i32_2 = arith.constant 0 : i32
    return %c0_i32, %c0_i32_0, %c0_i32_1 : i32, i32, i32
  }
  func.func @transform_5(%arg0: i32) -> (i32, i32, i32) {
    %c0_i32 = arith.constant 0 : i32
    %c0_i32_0 = arith.constant 0 : i32
    %c0_i32_1 = arith.constant 0 : i32
    %c0_i32_2 = arith.constant 0 : i32
    return %c0_i32, %c0_i32_0, %c0_i32_1 : i32, i32, i32
  }
  func.func @transform_6(%arg0: i32) -> (i32, i32, i32) {
    %c0_i32 = arith.constant 0 : i32
    %c0_i32_0 = arith.constant 0 : i32
    %c0_i32_1 = arith.constant 0 : i32
    %c0_i32_2 = arith.constant 0 : i32
    return %c0_i32, %c0_i32_0, %c0_i32_1 : i32, i32, i32
  }
  func.func @transform_7(%arg0: i32) -> (i32, i32, i32) {
    %c0_i32 = arith.constant 0 : i32
    %c0_i32_0 = arith.constant 0 : i32
    %c0_i32_1 = arith.constant 0 : i32
    return %arg0, %c0_i32, %c0_i32_0 : i32, i32, i32
  }
  func.func @transform_8(%arg0: i32) -> (i32, i32, i32, i32) {
    %c0_i32 = arith.constant 0 : i32
    %c0_i32_0 = arith.constant 0 : i32
    %c0_i32_1 = arith.constant 0 : i32
    %c0_i32_2 = arith.constant 0 : i32
    return %arg0, %c0_i32, %c0_i32_0, %c0_i32_1 : i32, i32, i32, i32
  }
}

</mosaic_0001>

<bundles_post_ra>
// kernel: tpu_custom_call.1
= control target key start
LH: loop header
LB: loop body
LE: loop exit
PB: predicated region body
PF: predicated region fallthrough
CT: control target
= control target key end

     0   :  { %s4453_s0 = inlined_call_operand.hbm [shape: f32[2,8,32], index: 0, kind: input, shape index: {}]   ;;  %s4454_s1 = inlined_call_operand.hbm [shape: f32[2,1,8], index: 1, kind: input, shape index: {}]   ;;  %s4455_s2 = inlined_call_operand.hbm [shape: f32[2,32,192], index: 2, kind: input, shape index: {}]   ;;  %s4456_s3 = inlined_call_operand.hbm [shape: f32[2,64,32], index: 3, kind: input, shape index: {}]   ;;  %s4457_s4 = inlined_call_operand.hbm [shape: f32[2,32,64], index: 4, kind: input, shape index: {}]   ;;  %s4458_s5 = inlined_call_operand.hbm [shape: f32[2,64,32], index: 5, kind: input, shape index: {}]   ;;  %s4459_s6 = inlined_call_operand.hbm [shape: f32[2,8,192], index: 6, kind: input, shape index: {}]   ;;  %s4460_s7 = inlined_call_operand.hbm [shape: f32[2,8,32], index: 7, kind: output, shape index: {0}]   ;;  %s4461_s8 = inlined_call_operand.hbm [shape: f32[2,2,32,8], index: 8, kind: output, shape index: {1}]  }
   0x1   :  { %4468 = sst [smem:[#allocation24_spill]] %s4453_s0 }
   0x2   :  { %4469 = sst [smem:[#allocation25_spill]] %s4455_s2 }
   0x3   :  { %4470 = sst [smem:[#allocation26_spill]] %s4456_s3 }
   0x4   :  { %14 = vsyncpa [#allocation3], 0 }
   0x5   :  { %16 = vsyncpa [#allocation3 + $0x1], 0 }
   0x6   :  { %17 = vsyncpa [#allocation6], 0 }
   0x7   :  { %19 = vsyncpa [#allocation6 + $0x1], 0 }
   0x8   :  { %20 = vsyncpa [#allocation9], 0 }
   0x9   :  { %21 = vsyncpa [#allocation12], 0 }
   0xa   :  { %22 = vsyncpa [#allocation4], 0 }
   0xb   :  { %24 = vsyncpa [#allocation4 + $0x1], 0 }
   0xc   :  { %25 = vsyncpa [#allocation16], 0 }
   0xd   :  { %27 = vsyncpa [#allocation16 + $0x1], 0  ;;  %s3761_s27 = smov 0   ;;  %s3763_s28 = smov 0  }
   0xe   :  { %s3765_s29 = smov 0   ;;  %s3767_s30 = smov 0  }
   0xf LB: > { %s3691_s9 = smov [#allocation7]   ;;  %s3782_s11 = sadd.s32 4294967295, %s3689_s30   ;;  %s3689_s30 = sphi %s3767_s30, %s4499_s30   ;;  %s3685_s29 = sphi %s3765_s29, %s4498_s29   ;;  %s3681_s28 = sphi %s3763_s28, %s4497_s28   ;;  %s3677_s27 = sphi %s3761_s27, %s4496_s27  }
  0x10   : > { %s259_s10 = sshll.u32 %s3691_s9, 4  ;;  %p2816_p0 = scmp.ge.s32.totalorder %s3689_s30, 1  ;;  %s3787_s10 = int_to_ptr.vmem [resolvable:$true] %s259_s10 }
  0x11   : > { %p4463_p1 = scmp.eq.s32.totalorder %s3782_s11, 0  ;;  %p247_p2 = scmp.lt.s32.totalorder %s3689_s30, 3 }
  0x12   : > { %s3692_s13 = smov [#allocation8]   ;;  %s3693_s16 = smov [#allocation11]  }
  0x13   : > { %p3789_p3 = pnand %p2816_p0, %p247_p2  ;;  %s272_s14 = sshll.u32 %s3692_s13, 4  ;;  %s3802_s14 = int_to_ptr.vmem [resolvable:$true] %s272_s14 }
  0x14   : > { %s3804_s17 = sshll.u32 %s3693_s16, 4  ;;  %s4473_s2 = sld [smem:[#allocation25_spill]]  ;;  %s299_s17 = int_to_ptr.vmem [resolvable:$true] %s3804_s17 }
  0x15   : > { %s4471_s12 = scalar_select %p3789_p3, 1, 0 }
  0x16   : > { %p3240_p5 = pneg %p3789_p3 }
  0x18   : > { %p3798_p6 = pnand %p3240_p5, %p4463_p1 }
  0x1a   : > { %s3375_s20 = scalar_lea.hbm %s4473_s2, 2048  ;;  %p3814_p8 = pneg %p3798_p6 }
  0x1b   : > { %p3376_p7 = scmp.ne.s32.totalorder %s4473_s2, %s3375_s20  ;;  %p3382_p11 = scmp.lt.u32.totalorder %s3375_s20, %s4473_s2 }
  0x1d   : > { %p3378_p9 = pnand %p3814_p8, %p3376_p7 }
  0x1f   : > { %p3379_p10 = pneg %p3378_p9 }
  0x21   : > { %p3384_p12 = pnand %p3382_p11, %p3379_p10 }
  0x23   : > { %3387 = shalt.err (!%p3384_p12)
}
  0x24   : > { %s3388_s26 = scalar_lea.vmem %s3787_s10, 2048  ;;  %p3396_p5 = scmp.lt.s32.totalorder %s3787_s10, %s3787_s10 }
  0x25   : > { %p3389_p13 = scmp.ne.s32.totalorder %s3787_s10, %s3388_s26  ;;  %p3397_p4 = scmp.lt.s32.totalorder %s3388_s26, %s3388_s26 }
  0x27   : > { %p3391_p0 = pnand %p3389_p13, %p3814_p8  ;;  %p3398_p7 = por %p3397_p4, %p3396_p5 }
  0x29   : > { %p3392_p2 = pneg %p3391_p0 }
  0x2b   : > { %p3399_p9 = pnand %p3398_p7, %p3392_p2 }
  0x2d   : > { %3402 = shalt.err (!%p3399_p9)
}
  0x2e   : > { %s4462_s9 = smov 256   ;;  %s4465_s13 = smov 16  }
  0x2f   : > { %3243 = dma.hbm_to_vmem [thread:$0]  (!%p3798_p6), %s4473_s2, 2048, %s3787_s10, [#allocation6], %s4462_s9, %s4462_s9, %s4465_s13  }
  0x30   : > { %s4475_s3 = sld [smem:[#allocation26_spill]] }
  0x36   : > { %s3403_s21 = scalar_lea.hbm %s4475_s3, 2048 }
  0x37   : > { %p3404_p4 = scmp.ne.s32.totalorder %s4475_s3, %s3403_s21  ;;  %p3410_p12 = scmp.lt.u32.totalorder %s3403_s21, %s4475_s3 }
  0x39   : > { %p3406_p10 = pnand %p3404_p4, %p3814_p8 }
  0x3b   : > { %p3407_p11 = pneg %p3406_p10 }
  0x3d   : > { %p3412_p13 = pnand %p3410_p12, %p3407_p11 }
  0x3f   : > { %3415 = shalt.err (!%p3412_p13)
}
  0x40   : > { %s3416_s10 = scalar_lea.vmem %s3802_s14, 2048  ;;  %p3424_p7 = scmp.lt.s32.totalorder %s3802_s14, %s3802_s14 }
  0x41   : > { %p3417_p0 = scmp.ne.s32.totalorder %s3802_s14, %s3416_s10  ;;  %p3425_p9 = scmp.lt.s32.totalorder %s3416_s10, %s3416_s10 }
  0x43   : > { %p3419_p2 = pnand %p3417_p0, %p3814_p8  ;;  %p3426_p4 = por %p3425_p9, %p3424_p7 }
  0x45   : > { %p3420_p5 = pneg %p3419_p2 }
  0x47   : > { %p3427_p10 = pnand %p3426_p4, %p3420_p5 }
  0x49   : > { %3430 = shalt.err (!%p3427_p10)
}
  0x4a   : > { %s3696_s16 = smov 128   ;;  %s3697_s18 = smov 8  }
  0x4b   : > { %3246 = dma.hbm_to_vmem [thread:$0]  (!%p3798_p6), %s4475_s3, 2048, %s3802_s14, [#allocation9], %s3696_s16, %s3696_s16, %s3697_s18  }
  0x4c   : > { %s3431_s24 = scalar_lea.hbm %s4458_s5, 2048 }
  0x4d   : > { %p3432_p11 = scmp.ne.s32.totalorder %s4458_s5, %s3431_s24  ;;  %p3438_p0 = scmp.lt.u32.totalorder %s3431_s24, %s4458_s5 }
  0x4f   : > { %p3434_p12 = pnand %p3432_p11, %p3814_p8 }
  0x51   : > { %p3435_p13 = pneg %p3434_p12 }
  0x53   : > { %p3440_p2 = pnand %p3438_p0, %p3435_p13 }
  0x55   : > { %3443 = shalt.err (!%p3440_p2)
}
  0x56   : > { %s3444_s19 = scalar_lea.vmem %s299_s17, 2048  ;;  %p3452_p4 = scmp.lt.s32.totalorder %s299_s17, %s299_s17 }
  0x57   : > { %p3445_p5 = scmp.ne.s32.totalorder %s299_s17, %s3444_s19  ;;  %p3453_p10 = scmp.lt.s32.totalorder %s3444_s19, %s3444_s19 }
  0x59   : > { %p3447_p7 = pnand %p3445_p5, %p3814_p8  ;;  %p3454_p1 = por %p3453_p10, %p3452_p4 }
  0x5b   : > { %p3448_p9 = pneg %p3447_p7 }
  0x5d   : > { %p3455_p3 = pnand %p3454_p1, %p3448_p9 }
  0x5f   : > { %3458 = shalt.err (!%p3455_p3)
}
  0x60   : > { %3252 = dma.hbm_to_vmem [thread:$0]  (!%p3798_p6), %s4458_s5, 2048, %s299_s17, [#allocation12], %s3696_s16, %s3696_s16, %s3697_s18  }
  0x61   : > { %s3698_s20 = smov [#allocation10]   ;;  %s3699_s22 = smov [#allocation13]  }
  0x62   : > { %s285_s21 = sshll.u32 %s3698_s20, 4  ;;  %s311_s24 = sshll.u32 %s3699_s22, 4  ;;  %s286_s21 = int_to_ptr.vmem [resolvable:$true] %s285_s21  ;;  %s312_s24 = int_to_ptr.vmem [resolvable:$true] %s311_s24 }
  0x63   : > { %s3459_s10 = scalar_lea.hbm %s4457_s4, 1024 }
  0x64   : > { %p3460_p1 = scmp.ne.s32.totalorder %s4457_s4, %s3459_s10  ;;  %p3466_p12 = scmp.lt.u32.totalorder %s3459_s10, %s4457_s4 }
  0x66   : > { %p3462_p3 = pnand %p3460_p1, %p3814_p8 }
  0x68   : > { %p3463_p11 = pneg %p3462_p3 }
  0x6a   : > { %p3468_p13 = pnand %p3466_p12, %p3463_p11 }
  0x6c   : > { %3471 = shalt.err (!%p3468_p13)
}
  0x6d   : > { %s3472_s17 = scalar_lea.vmem %s286_s21, 1024  ;;  %p3480_p7 = scmp.lt.s32.totalorder %s286_s21, %s286_s21 }
  0x6e   : > { %p3473_p0 = scmp.ne.s32.totalorder %s286_s21, %s3472_s17  ;;  %p3481_p9 = scmp.lt.s32.totalorder %s3472_s17, %s3472_s17 }
  0x70   : > { %p3475_p2 = pnand %p3473_p0, %p3814_p8  ;;  %p3482_p4 = por %p3481_p9, %p3480_p7 }
  0x72   : > { %p3476_p5 = pneg %p3475_p2 }
  0x74   : > { %p3483_p10 = pnand %p3482_p4, %p3476_p5 }
  0x76   : > { %3486 = shalt.err (!%p3483_p10)
}
  0x77   : > { %3249 = dma.hbm_to_vmem [thread:$0]  (!%p3798_p6), %s4457_s4, 1024, %s286_s21, [#allocation9], %s3696_s16, %s3696_s16, %s3697_s18  }
  0x78   : > { %s3487_s22 = scalar_lea.hbm %s4459_s6, 512 }
  0x79   : > { %p3488_p1 = scmp.ne.s32.totalorder %s4459_s6, %s3487_s22  ;;  %p3494_p12 = scmp.lt.u32.totalorder %s3487_s22, %s4459_s6 }
  0x7b   : > { %p3490_p3 = pnand %p3488_p1, %p3814_p8 }
  0x7d   : > { %p3491_p11 = pneg %p3490_p3 }
  0x7f   : > { %p3496_p13 = pnand %p3494_p12, %p3491_p11 }
  0x81   : > { %3499 = shalt.err (!%p3496_p13)
}
  0x82   : > { %s3500_s14 = scalar_lea.vmem %s312_s24, 512  ;;  %p3508_p7 = scmp.lt.s32.totalorder %s312_s24, %s312_s24 }
  0x83   : > { %p3501_p0 = scmp.ne.s32.totalorder %s312_s24, %s3500_s14  ;;  %p3509_p9 = scmp.lt.s32.totalorder %s3500_s14, %s3500_s14 }
  0x85   : > { %p3503_p2 = pnand %p3501_p0, %p3814_p8  ;;  %p3510_p4 = por %p3509_p9, %p3508_p7 }
  0x87   : > { %p3504_p5 = pneg %p3503_p2 }
  0x89   : > { %p3511_p10 = pnand %p3510_p4, %p3504_p5 }
  0x8b   : > { %3514 = shalt.err (!%p3511_p10)
}
  0x8c   : > { %s4476_s16 = smov 16   ;;  %s4477_s18 = smov 256  }
  0x8d   : > { %3255 = dma.hbm_to_vmem [thread:$0]  (!%p3798_p6), %s4459_s6, 512, %s312_s24, [#allocation12], %s4477_s18, %s4477_s18, %s4476_s16  }
  0x8e   : > { %s2815_s15 = sadd.s32 4294967294, %s3689_s30   ;;  %s3930_s23 = sadd.s32 1, %s3689_s30  }
  0x8f   : > { %s40_s2 = sadd.s32 1, %s3685_s29  ;;  %s37_s13 = ssub.s32 %s3689_s30, %s3930_s23 }
  0x90   : > { %p47_p8 = scmp.ne.s32.totalorder %s3685_s29, %s3681_s28  ;;  %p38_p1 = scmp.eq.s32.totalorder %s37_s13, 0 }
  0x91   : > { %p48_p3 = scmp.eq.s32.totalorder %s3689_s30, 0  ;;  %p53_p11 = scmp.ne.s32.totalorder %s3681_s28, %s3677_s27 }
  0x92   : > { %p208_p12 = scmp.eq.s32.totalorder %s3782_s11, 1  ;;  %p4478_p0 = scmp.eq.s32.totalorder %s3782_s11, 0 }
  0x93   : > { %s3942_s9 = scalar_select %p38_p1, %s3685_s29, %s40_s2  }
  0x94   : > { %p49_p13 = por %p48_p3, %p47_p8  ;;  %p3946_p2 = por %p4478_p0, %p53_p11 }
  0x95   : > { %p3950_p6 = por %p208_p12, %p47_p8  ;;  %p214_p5 = scmp.eq.s32.totalorder %s2815_s15, 1 }
  0x96   : > { %s4479_s24 = scalar_select %p3946_p2, 1, 0 }
  0x97   : > { %s4480_s20 = scalar_select %p3950_p6, 1, 0 }
  0x98   : > { %p3275_p7 = scmp.lt.s32.totalorder %s3689_s30, 2  ;;  %s3956_s22 = sand.u32 1, %s3685_s29  }
  0x99   : > { %p3958_p9 = por %p214_p5, %p53_p11  ;;  %s2823_s26 = sshll.u32 %s3956_s22, 3 }
  0x9a   : > { %s2824_s10 = sshll.u32 %s3689_s30, 7  ;;  %s4482_s0 = sld [smem:[#allocation24_spill]] }
  0x9b   : > { %s4481_s25 = scalar_select %p3958_p9, 1, 0 }
  0x9c   : > { %s329_s18 = scalar_lea.vmem [#allocation2], %s2823_s26  ;;  %p3969_p4 = pnand %p3275_p7, %p49_p13 }
  0x9d   : > { %s336_s21 = sshll.u32 %s329_s18, 4  ;;  %s326_s2 = scalar_lea.sflag [#allocation3], %s3956_s22  ;;  %s3973_s21 = int_to_ptr.vmem [resolvable:$true] %s336_s21 }
  0x9e   : > { %p3517_p8 = pneg %p3969_p4 }
  0xa0   : > { %s3967_s16 = scalar_lea.hbm %s4482_s0, %s2824_s10  ;;  %s3520_s19 = scalar_lea.hbm %s4482_s0, 256 }
  0xa1   : > { %s3515_s13 = scalar_lea.hbm %s3967_s16, 128  ;;  %p3521_p11 = scmp.lt.u32.totalorder %s3967_s16, %s4482_s0 }
  0xa2   : > { %p3516_p10 = scmp.ne.s32.totalorder %s3967_s16, %s3515_s13  ;;  %p3522_p12 = scmp.lt.u32.totalorder %s3520_s19, %s3515_s13 }
  0xa3   : > { %p3524_p0 = scmp.lt.u32.totalorder %s3515_s13, %s3967_s16 }
  0xa4   : > { %p3518_p1 = pnand %p3517_p8, %p3516_p10  ;;  %p3523_p13 = por %p3522_p12, %p3521_p11 }
  0xa6   : > { %p3519_p3 = pneg %p3518_p1  ;;  %p3525_p5 = por %p3524_p0, %p3523_p13 }
  0xa8   : > { %p3526_p7 = pnand %p3525_p5, %p3519_p3 }
  0xaa   : > { %3529 = shalt.err (!%p3526_p7)
}
  0xab   : > { %s3530_s15 = scalar_lea.vmem %s3973_s21, 128  ;;  %s3700_s26 = smov [#allocation2]  }
  0xac   : > { %p3531_p10 = scmp.ne.s32.totalorder %s3973_s21, %s3530_s15  ;;  %s3535_s10 = sshll.u32 %s3700_s26, 4  ;;  %s3536_s10 = int_to_ptr.vmem [resolvable:$false] %s3535_s10 }
  0xad   : > { %s3537_s14 = scalar_lea.vmem %s3536_s10, 256  ;;  %p3538_p6 = scmp.lt.s32.totalorder %s3973_s21, %s3536_s10 }
  0xae   : > { %p3533_p1 = pnand %p3531_p10, %p3517_p8  ;;  %p3539_p11 = scmp.lt.s32.totalorder %s3537_s14, %s3530_s15 }
  0xb0   : > { %p3534_p9 = pneg %p3533_p1  ;;  %p3540_p12 = por %p3539_p11, %p3538_p6 }
  0xb2   : > { %p3541_p13 = pnand %p3540_p12, %p3534_p9 }
  0xb4   : > { %3544 = shalt.err (!%p3541_p13)
}
  0xb5   : > { %3259 = dma.hbm_to_vmem [thread:$0]  (!%p3969_p4), %s3967_s16, 128, %s3973_s21, %s326_s2  }
  0xb6   : > { %s2825_s13 = sshll.u32 %s3689_s30, 4  ;;  %s346_s15 = scalar_lea.vmem [#allocation5], %s3956_s22 }
  0xb7   : > { %s4006_s26 = scalar_lea.hbm %s4454_s1, %s2825_s13  ;;  %s353_s10 = sshll.u32 %s346_s15, 4  ;;  %s354_s10 = int_to_ptr.vmem [resolvable:$true] %s353_s10 }
  0xb8   : > { %s4484_s14 = sand.u32 1, %s3689_s30   ;;  %s3545_s3 = scalar_lea.hbm %s4006_s26, 16 }
  0xb9   : > { %s344_s0 = scalar_lea.sflag [#allocation6], %s4484_s14  ;;  %p3546_p6 = scmp.ne.s32.totalorder %s4006_s26, %s3545_s3 }
  0xba   : > { %s3550_s2 = scalar_lea.hbm %s4454_s1, 32  ;;  %p3551_p0 = scmp.lt.u32.totalorder %s4006_s26, %s4454_s1 }
  0xbb   : > { %p3548_p9 = pnand %p3546_p6, %p3517_p8  ;;  %p3552_p5 = scmp.lt.u32.totalorder %s3550_s2, %s3545_s3 }
  0xbc   : > { %p3554_p10 = scmp.lt.u32.totalorder %s3545_s3, %s4006_s26 }
  0xbd   : > { %p3549_p3 = pneg %p3548_p9  ;;  %p3553_p7 = por %p3552_p5, %p3551_p0 }
  0xbf   : > { %p3555_p1 = por %p3554_p10, %p3553_p7 }
  0xc1   : > { %p3556_p11 = pnand %p3555_p1, %p3549_p3 }
  0xc3   : > { %3559 = shalt.err (!%p3556_p11)
}
  0xc4   : > { %s3560_s22 = scalar_lea.vmem %s354_s10, 16  ;;  %s3701_s18 = smov [#allocation5]  }
  0xc5   : > { %p3561_p12 = scmp.ne.s32.totalorder %s354_s10, %s3560_s22  ;;  %s3565_s15 = sshll.u32 %s3701_s18, 4  ;;  %s3566_s15 = int_to_ptr.vmem [resolvable:$false] %s3565_s15 }
  0xc6   : > { %s3567_s14 = scalar_lea.vmem %s3566_s15, 32  ;;  %p3568_p9 = scmp.lt.s32.totalorder %s354_s10, %s3566_s15 }
  0xc7   : > { %p3563_p13 = pnand %p3561_p12, %p3517_p8  ;;  %p3569_p2 = scmp.lt.s32.totalorder %s3567_s14, %s3560_s22 }
  0xc9   : > { %p3564_p6 = pneg %p3563_p13  ;;  %p3570_p0 = por %p3569_p2, %p3568_p9 }
  0xcb   : > { %p3571_p5 = pnand %p3570_p0, %p3564_p6 }
  0xcd   : > { %3574 = shalt.err (!%p3571_p5)
}
  0xce   : > { %3262 = dma.hbm_to_vmem [thread:$0]  (!%p3969_p4), %s4006_s26, 16, %s354_s10, %s344_s0  }
  0xcf   : > { %p4485_p3 = scmp.ne.s32.totalorder %s4471_s12, 0 }
  0xd0   : > { %s4033_s3 = sand.u32 (!%p4485_p3), 1, %s3681_s28   ;;  %p4486_p2 = scmp.ne.s32.totalorder (!%p4485_p3), %s4479_s24, 0 }
  0xd1   : > { %362 = sbr.rel (%p4485_p3) target bundleno = 5251 (0x1483), region = 48  ;;  %s2827_s16 = sshll.u32 (!%p4485_p3), %s4033_s3, 3 }
  0xd2   : > { %s365_s21 = scalar_lea.sflag (!%p4485_p3), [#allocation3], %s4033_s3  ;;  %s4039_s2 = scalar_lea.vmem (!%p4485_p3), [#allocation2], %s2827_s16 }
  0xd8   : > { %3648 = dma.done.wait (%p4486_p2), %s365_s21, 128  }
  0xd9   : > { %3650 = vsyncadd (%p4486_p2), %s365_s21, 4294967168  ;;  %s373_s0 = sand.u32 1, %s3782_s11   ;;  %s376_s17 = scalar_lea.vmem [#allocation5], %s4033_s3 }
  0xda   : > { %s374_s12 = scalar_lea.sflag [#allocation6], %s373_s0 }
  0xdb   : > { %3652 = dma.done.wait (%p4486_p2), %s374_s12, 16  }
  0xdc   : > { %3654 = vsyncadd (%p4486_p2), %s374_s12, 4294967280  ;;  %p4487_p4 = scmp.eq.s32.totalorder %s3782_s11, 0 }
  0xde   : > { %3656 = dma.done.wait (%p4487_p4), [#allocation6], 2048   ;;  %p4488_p8 = pmov %p4487_p4 }
  0xdf   : > { %p4489_p7 = pmov %p4487_p4 }
  0xe0   : > { %3658 = vsyncadd (%p4488_p8), [#allocation6], 4294965248 }
  0xe1   : > { %3660 = dma.done.wait (%p4489_p7), [#allocation9], 3072   ;;  %p4490_p10 = pmov %p4487_p4 }
  0xe2   : > { %p4491_p1 = pmov %p4487_p4 }
  0xe3   : > { %3662 = vsyncadd (%p4490_p10), [#allocation9], 4294964224 }
  0xe4   : > { %3664 = dma.done.wait (%p4491_p1), [#allocation12], 2560   ;;  %p4492_p11 = pmov %p4491_p1 }
  0xe5   : > { %v3702_v0 = vmov 0.0   ;;  %v447_v1 = vld [vmem:[#allocation7 + $0x8] sm:$0xff]  ;;  %v449_v2 = vld [vmem:[#allocation7 + $0x18] sm:$0xff]  ;;  %v446_v3 = vld [vmem:[#allocation7] sm:$0xff]  ;;  %vm484_vm0 = vcmask 261120   ;;  %v476_v14 = vlaneseq  ;;  %vm3703_vm1 = vmmov 0  }
  0xe6   : > { %3666 = vsyncadd (%p4492_p11), [#allocation12], 4294964736  ;;  %552 = vmatprep.mubr.f32.mxu0 %v3702_v0  ;;  %2963 = vmatprep.subr.mxu1 %v3702_v0  ;;  %v3136_v4 = vpack.c.bf16 %v449_v2, %v447_v1  ;;  %v448_v5 = vld [vmem:[#allocation7 + $0x10] sm:$0xff]  ;;  %v451_v6 = vld [vmem:[#allocation7 + $0x28] sm:$0xff]  ;;  %s3704_s24 = smov 80   ;;  %s3705_s26 = smov 112  }
  0xe7   : > { %v453_v7 = vld [vmem:[#allocation7 + $0x38] sm:$0xff]  ;;  %v3138_v8 = vpack.c.bf16 %v448_v5, %v446_v3  ;;  %v450_v10 = vld [vmem:[#allocation7 + $0x20] sm:$0xff]  ;;  %v452_v11 = vld [vmem:[#allocation7 + $0x30] sm:$0xff]  ;;  %v4071_v15 = vshrl.u32 %v476_v14, 7  ;;  %2965 = vmatprep.mubr.msk.f32.mxu1 %vm3703_vm1, %v3702_v0  ;;  %s3706_s10 = smov 16   ;;  %s3707_s13 = smov 64  }
  0xe8   : > { %v3140_v9 = vpack.c.bf16 %v453_v7, %v451_v6  ;;  %3137 = vmatprep.subr.bf16.mxu0 %v3136_v4  ;;  %v3142_v12 = vpack.c.bf16 %v452_v11, %v450_v10  ;;  %v4066_v13 = vld [vmem:[%s4039_s2] sm:$0xff]  ;;  %v4080_v17 = vld [vmem:[#allocation13] sm:$0xff]  ;;  %s3708_s19 = smov 96   ;;  %s3709_s22 = smov 32   ;;  %vm562_vm2 = vcmask 130048   ;;  %vm639_vm3 = vcmask 64512  }
  0xe9   : > { %3139 = vmatpush1.bf16.msra.mxu0 %v3138_v8  ;;  %v4078_v16 = vsub.s32 0, %v4071_v15  ;;  %v475_v22 = vld [vmem:[#allocation13 + $0x8] sm:$0xff]  ;;  %s3710_s18 = smov 48   ;;  %s2834_s15 = sshll.u32 %s4033_s3, 6  ;;  %vm1240_vm4 = vcmask 392192   ;;  %vm1246_vm5 = vcmask 523264  }
  0xea   : > { %3141 = vmatprep.subr.bf16.mxu0 %v3140_v9  ;;  %v4125_v33 = vld [vmem:[%s376_s17] ss:$0 sm:$0xff]  ;;  %s4147_s14 = scalar_lea.vmem [#allocation15], %s2834_s15  ;;  %s2879_s21 = sshll.u32 %s3782_s11, 10 }
  0xeb   : > { %v479_v18 = vrot.slane %v4080_v17, %v4078_v16  ;;  %v483_v23 = vrot.slane %v475_v22, %v4078_v16  ;;  %s2643_s2 = sshll.u32 %s4147_s14, 4  ;;  %s4368_s17 = scalar_lea.hbm %s4461_s8, %s2879_s21  ;;  %s4370_s2 = int_to_ptr.vmem [resolvable:$true] %s2643_s2 }
  0xec   : > { %p4493_p13 = scmp.ne.s32.totalorder %s4480_s20, 0 }
  0xed   : > { %3143 = vmatpush1.bf16.msra.mxu0 %v3142_v12 }
  0xee   : > { %2958 = vmatprep.subr.mxu0 %v3702_v0 }
  0xf0   : > { %2836 = vmatmul.mubr.msk.f32.vlgmr.msra.gmra.mrb[0].mxu0 %vm484_vm0, %v4066_v13 }
  0xf1   : > { %2960 = vmatprep.mubr.msk.f32.mxu0 %vm3703_vm1, %v3702_v0 }
 0x1c3   : > { %v554_v19 = vpop.f32.mrb[0].mxu0 }
 0x1c4   : > { %v4084_v20 = vadd.f32 %v554_v19, %v479_v18  ;;  %v556_v21 = vpop.f32.mrb[1].mxu0 }
 0x1c5   : > { %v4095_v24 = vadd.f32 %v556_v21, %v483_v23 }
 0x1c6   : > { %727 = vrot.lane.b32.xlu1 %v4084_v20, %s3704_s24  ;;  %560 = vrot.lane.b32.xlu0 %v4084_v20, %s3705_s26 }
 0x1ca   : > { %896 = vrot.lane.b32.xlu1 %v4084_v20, %s3706_s10  ;;  %729 = vrot.lane.b32.xlu0 %v4084_v20, %s3707_s13 }
 0x1ce   : > { %1061 = vrot.lane.b32.xlu1 %v4095_v24, %s3708_s19  ;;  %894 = vrot.lane.b32.xlu0 %v4084_v20, %s3709_s22 }
 0x1d2   : > { %1059 = vrot.lane.b32.xlu0 %v4095_v24, %s3705_s26 }
 0x238   : > { %v728_v25 = vpop.permute.xlu1 %727  ;;  %v561_v26 = vpop.permute.xlu0 %560 }
 0x239   : > { %2959 = vmatpush3.xpose.msk.msra.mxu0 %vm562_vm2, %v561_v26 }
 0x23a   : > { %2968 = vmatprep.subr.mxu0 %v3702_v0 }
 0x23c   : > { %2961 = vmatmul.mubr.msk.f32.vlgmr.msra.gmra.mrb[2].mxu0 %vm562_vm2, %v4084_v20  ;;  %v730_v27 = vpop.permute.xlu0 %729  ;;  %v897_v28 = vpop.permute.xlu1 %896 }
 0x23d   : > { %2969 = vmatpush3.xpose.msk.msra.mxu0 %vm562_vm2, %v730_v27  ;;  %2970 = vmatprep.mubr.msk.f32.mxu0 %vm3703_vm1, %v3702_v0 }
 0x23e   : > { %2978 = vmatprep.subr.mxu0 %v3702_v0 }
 0x240   : > { %2971 = vmatmul.mubr.msk.f32.vlgmr.msra.gmra.mrb[4].mxu0 %vm562_vm2, %v728_v25  ;;  %v895_v29 = vpop.permute.xlu0 %894  ;;  %v1062_v30 = vpop.permute.xlu1 %1061 }
 0x241   : > { %2979 = vmatpush3.xpose.msk.msra.mxu0 %vm562_vm2, %v897_v28  ;;  %2980 = vmatprep.mubr.msk.f32.mxu0 %vm3703_vm1, %v3702_v0 }
 0x242   : > { %2988 = vmatprep.subr.mxu0 %v3702_v0 }
 0x244   : > { %2981 = vmatmul.mubr.msk.f32.vlgmr.msra.gmra.mrb[6].mxu0 %vm562_vm2, %v895_v29  ;;  %v1060_v31 = vpop.permute.xlu0 %1059 }
 0x245   : > { %2989 = vmatpush3.xpose.msk.msra.mxu0 %vm562_vm2, %v1062_v30  ;;  %2990 = vmatprep.mubr.msk.f32.mxu0 %vm3703_vm1, %v3702_v0  ;;  %v455_v30 = vld [vmem:[#allocation8 + $0x8] sm:$0xff] }
 0x248   : > { %2991 = vmatmul.mubr.msk.f32.vlgmr.msra.gmra.mrb[8].mxu0 %vm562_vm2, %v1060_v31  ;;  %v456_v31 = vld [vmem:[#allocation8 + $0x10] sm:$0xff] }
 0x249   : > { %3014 = vmatprep.mubr.msk.f32.mxu0 %vm3703_vm1, %v3702_v0 }
 0x30f   : > { %v633_v32 = vpop.f32.mrb[2].mxu0 }
 0x310   : > { %v637_v34 = vmul.f32 0.25, %v633_v32  ;;  %v2962_v35 = vpop.f32.mrb[3].mxu0  ;;  %v3711_v32 = vmov 0.0|0.0  }
 0x311   : > { %3144 = vmatprep.subr.bf16.mxu0 %v3711_v32  ;;  %v457_v35 = vld [vmem:[#allocation8 + $0x18] sm:$0xff] }
 0x312   : > { %v638_v36 = vadd.f32 %v4125_v33, %v637_v34 }
 0x313   : > { %v801_v37 = vpop.f32.mrb[4].mxu0 }
 0x314   : > { %v805_v38 = vmul.f32 0.25, %v801_v37  ;;  %v2972_v39 = vpop.f32.mrb[5].mxu0  ;;  %v640_v40 = vsel %vm639_vm3, %v638_v36, -inf }
 0x315   : > { %641 = vmax.xlane.f32.xlu1 %v640_v40  ;;  %v459_v39 = vld [vmem:[#allocation8 + $0x28] sm:$0xff] }
 0x316   : > { %v806_v41 = vadd.f32 %v4125_v33, %v805_v38  ;;  %v458_v38 = vld [vmem:[#allocation8 + $0x20] sm:$0xff] }
 0x317   : > { %v968_v42 = vpop.f32.mrb[6].mxu0 }
 0x318   : > { %v972_v43 = vmul.f32 0.25, %v968_v42  ;;  %v2982_v44 = vpop.f32.mrb[7].mxu0  ;;  %v807_v45 = vsel %vm639_vm3, %v806_v41, -inf }
 0x319   : > { %808 = vmax.xlane.f32.xlu0 %v807_v45  ;;  %v461_v44 = vld [vmem:[#allocation8 + $0x38] sm:$0xff] }
 0x31a   : > { %v973_v46 = vadd.f32 %v4125_v33, %v972_v43  ;;  %v460_v43 = vld [vmem:[#allocation8 + $0x30] sm:$0xff] }
 0x31b   : > { %v1133_v47 = vpop.f32.mrb[8].mxu0 }
 0x31c   : > { %v1137_v48 = vmul.f32 0.25, %v1133_v47  ;;  %v2992_v49 = vpop.f32.mrb[9].mxu0  ;;  %v974_v50 = vsel %vm639_vm3, %v973_v46, -inf }
 0x31d   : > { %975 = vmax.xlane.f32.xlu0 %v974_v50 }
 0x31e   : > { %v1138_v51 = vadd.f32 %v4125_v33, %v1137_v48 }
 0x320   : > { %v1139_v52 = vsel %vm639_vm3, %v1138_v51, -inf }
 0x321   : > { %1140 = vmax.xlane.f32.xlu1 %v1139_v52 }
 0x3a2   : > { %v642_v53 = vpop.xlane.xlu1 %641 }
 0x3a3   : > { %v643_v54 = vsub.f32 %v638_v36, %v642_v53  ;;  %v3148_v36 = vpack.c.bf16 %v457_v35, %v456_v31  ;;  %v471_v35 = vld [vmem:[#allocation11 + $0x28] sm:$0xff] }
 0x3a5   : > { %v644_v55 = vmul.f32 1.442695, %v643_v54 }
 0x3a6   : > { %v809_v56 = vpop.xlane.xlu0 %808 }
 0x3a7   : > { %3335 = vpow2.f32 %v644_v55  ;;  %v810_v57 = vsub.f32 %v806_v41, %v809_v56  ;;  %v3151_v41 = vpack.c.bf16 %v459_v39, %v458_v38  ;;  %v473_v38 = vld [vmem:[#allocation11 + $0x38] sm:$0xff] }
 0x3a9   : > { %v811_v58 = vmul.f32 1.442695, %v810_v57  ;;  %v1244_v57 = vsub.s32 1, %v4071_v15 }
 0x3aa   : > { %v976_v59 = vpop.xlane.xlu0 %975 }
 0x3ab   : > { %3337 = vpow2.f32 %v811_v58  ;;  %v977_v60 = vsub.f32 %v973_v46, %v976_v59  ;;  %v3154_v46 = vpack.c.bf16 %v461_v44, %v460_v43  ;;  %v1245_v58 = vrot.slane %v4080_v17, %v1244_v57 }
 0x3ad   : > { %v978_v61 = vmul.f32 1.442695, %v977_v60 }
 0x3ae   : > { %v1141_v5 = vpop.xlane.xlu1 %1140 }
 0x3af   : > { %3339 = vpow2.f32 %v978_v61  ;;  %v1142_v6 = vsub.f32 %v1138_v51, %v1141_v5 }
 0x3b1   : > { %v3336_v62 = vpop.eup %3335  ;;  %v1143_v7 = vmul.f32 1.442695, %v1142_v6  ;;  %v462_v6 = vld [vmem:[#allocation10] sm:$0xff] }
 0x3b2   : > { %v646_v63 = vsel %vm639_vm3, %v3336_v62, 0.0 }
 0x3b3   : > { %647 = vadd.xlane.f32.xlu0 %v646_v63  ;;  %3341 = vpow2.f32 %v1143_v7  ;;  %v463_v7 = vld [vmem:[#allocation10 + $0x8] sm:$0xff] }
 0x3b5   : > { %v3338_v1 = vpop.eup %3337 }
 0x3b6   : > { %v813_v2 = vsel %vm639_vm3, %v3338_v1, 0.0 }
 0x3b7   : > { %814 = vadd.xlane.f32.xlu1 %v813_v2 }
 0x3b9   : > { %v3340_v3 = vpop.eup %3339 }
 0x3ba   : > { %v980_v4 = vsel %vm639_vm3, %v3340_v3, 0.0 }
 0x3bb   : > { %981 = vadd.xlane.f32.xlu0 %v980_v4 }
 0x3bd   : > { %v3342_v8 = vpop.eup %3341 }
 0x3be   : > { %v1145_v9 = vsel %vm639_vm3, %v3342_v8, 0.0 }
 0x3c8   : > { %818 = vrot.lane.b32.xlu1 %v4084_v20, %s3710_s18 }
 0x3d1   : > { %651 = vrot.lane.b32.xlu0 %v4084_v20, %s3708_s19 }
 0x3ec   : > { %1146 = vadd.xlane.f32.xlu1 %v1145_v9  ;;  %v464_v9 = vld [vmem:[#allocation10 + $0x10] sm:$0xff] }
 0x3fd   : > { %1150 = vrot.lane.b32.xlu1 %v4095_v24, %s3704_s24 }
 0x440   : > { %v648_v10 = vpop.xlane.xlu0 %647 }
 0x441   : > { %3343 = vrcp.f32 %v648_v10  ;;  %v465_v10 = vld [vmem:[#allocation10 + $0x18] sm:$0xff] }
 0x444   : > { %v815_v11 = vpop.xlane.xlu1 %814 }
 0x445   : > { %3345 = vrcp.f32 %v815_v11  ;;  %v3160_v11 = vpack.c.bf16 %v465_v10, %v464_v9 }
 0x448   : > { %v982_v12 = vpop.xlane.xlu0 %981  ;;  %v819_v20 = vpop.permute.xlu1 %818 }
 0x449   : > { %3347 = vrcp.f32 %v982_v12 }
 0x44b   : > { %v3344_v14 = vpop.eup %3343 }
 0x44c   : > { %v652_v18 = vpop.permute.xlu0 %651  ;;  %v650_v19 = vmul.f32 %v3344_v14, %v3336_v62 }
 0x44d   : > { %2964 = vmatpush3.msra.mxu1 %v652_v18  ;;  %v1337_v18 = vsub.s32 2, %v4071_v15 }
 0x44e   : > { %2966 = vmatmul.mubr.msk.f32.vlgmr.msra.gmra.mrb[0].mxu1 %vm639_vm3, %v650_v19  ;;  %1524 = vst.msk [vmem:[%s4147_s14] sm:$0xff] %vm639_vm3, %v650_v19  ;;  %2973 = vmatprep.subr.mxu1 %v3702_v0  ;;  %v1342_v19 = vsub.s32 3, %v4071_v15 }
 0x44f   : > { %v3346_v21 = vpop.eup %3345  ;;  %2974 = vmatpush3.msra.mxu1 %v819_v20  ;;  %2975 = vmatprep.mubr.msk.f32.mxu1 %vm3703_vm1, %v3702_v0  ;;  %v1338_v20 = vrot.slane %v4080_v17, %v1337_v18 }
 0x450   : > { %v817_v22 = vmul.f32 %v3346_v21, %v3338_v1  ;;  %2983 = vmatprep.subr.mxu1 %v3702_v0 }
 0x452   : > { %1525 = vst.msk [vmem:[%s4147_s14 + $0x8] sm:$0xff] %vm639_vm3, %v817_v22  ;;  %2976 = vmatmul.mubr.msk.f32.vlgmr.msra.gmra.mrb[2].mxu1 %vm639_vm3, %v817_v22 }
 0x453   : > { %v3348_v23 = vpop.eup %3347  ;;  %2984 = vmatpush3.msra.mxu1 %v4095_v24  ;;  %2985 = vmatprep.mubr.msk.f32.mxu1 %vm3703_vm1, %v3702_v0  ;;  %v454_v24 = vld [vmem:[#allocation8] sm:$0xff] }
 0x454   : > { %v984_v25 = vmul.f32 %v3348_v23, %v3340_v3  ;;  %2993 = vmatprep.subr.mxu1 %v3702_v0  ;;  %v3145_v34 = vpack.c.bf16 %v455_v30, %v454_v24  ;;  %v1343_v23 = vrot.slane %v4080_v17, %v1342_v19  ;;  %v468_v24 = vld [vmem:[#allocation11 + $0x10] sm:$0xff]  ;;  %v469_v30 = vld [vmem:[#allocation11 + $0x18] sm:$0xff] }
 0x455   : > { %v3166_v31 = vpack.c.bf16 %v469_v30, %v468_v24  ;;  %v1562_v24 = vld [vmem:[#allocation13 + $0x18] sm:$0xff] }
 0x456   : > { %1526 = vst.msk [vmem:[%s4147_s14 + $0x10] sm:$0xff] %vm639_vm3, %v984_v25  ;;  %2986 = vmatmul.mubr.msk.f32.vlgmr.msra.gmra.mrb[4].mxu1 %vm639_vm3, %v984_v25  ;;  %3146 = vmatpush3.bf16.msra.mxu0 %v3145_v34  ;;  %v466_v25 = vld [vmem:[#allocation11] sm:$0xff] }
 0x457   : > { %2995 = vmatprep.mubr.msk.f32.mxu1 %vm3703_vm1, %v3702_v0  ;;  %3147 = vmatprep.subr.bf16.mxu0 %v3711_v32  ;;  %v470_v34 = vld [vmem:[#allocation11 + $0x20] sm:$0xff] }
 0x45a   : > { %3149 = vmatpush3.bf16.msra.mxu0 %v3148_v36  ;;  %v3169_v36 = vpack.c.bf16 %v471_v35, %v470_v34 }
 0x45b   : > { %3150 = vmatprep.subr.bf16.mxu0 %v3711_v32 }
 0x45e   : > { %3152 = vmatpush3.bf16.msra.mxu0 %v3151_v41 }
 0x45f   : > { %3153 = vmatprep.subr.bf16.mxu0 %v3711_v32 }
 0x462   : > { %3155 = vmatpush3.bf16.msra.mxu0 %v3154_v46  ;;  %v1425_v46 = vsub.s32 5, %v4071_v15 }
 0x479   : > { %v1147_v26 = vpop.xlane.xlu1 %1146 }
 0x47a   : > { %3349 = vrcp.f32 %v1147_v26  ;;  %v467_v26 = vld [vmem:[#allocation11 + $0x8] sm:$0xff] }
 0x47d   : > { %v1151_v27 = vpop.permute.xlu1 %1150 }
 0x47e   : > { %2994 = vmatpush3.msra.mxu1 %v1151_v27 }
 0x47f   : > { %3156 = vmatprep.subr.bf16.mxu1 %v3711_v32 }
 0x484   : > { %v3350_v28 = vpop.eup %3349 }
 0x485   : > { %v1149_v29 = vmul.f32 %v3350_v28, %v3342_v8  ;;  %v3157_v8 = vpack.c.bf16 %v463_v7, %v462_v6  ;;  %v3163_v28 = vpack.c.bf16 %v467_v26, %v466_v25  ;;  %v1535_v6 = vld [vmem:[#allocation7 + $0x70] sm:$0xff] }
 0x486   : > { %v4237_v25 = vld [vmem:[#allocation13 + $0x10] sm:$0xff] }
 0x487   : > { %1527 = vst.msk [vmem:[%s4147_s14 + $0x18] sm:$0xff] %vm639_vm3, %v1149_v29  ;;  %2996 = vmatmul.mubr.msk.f32.vlgmr.msra.gmra.mrb[6].mxu1 %vm639_vm3, %v1149_v29  ;;  %v1566_v26 = vrot.slane %v4237_v25, %v4078_v16 }
 0x488   : > { %3025 = vmatprep.mubr.msk.f32.mxu1 %vm3703_vm1, %v3702_v0  ;;  %3158 = vmatpush3.bf16.msra.mxu1 %v3157_v8 }
 0x489   : > { %3159 = vmatprep.subr.bf16.mxu1 %v3711_v32 }
 0x48c   : > { %3161 = vmatpush3.bf16.msra.mxu1 %v3160_v11  ;;  %v1516_v11 = vsub.s32 6, %v4071_v15 }
 0x48d   : > { %3162 = vmatprep.subr.bf16.mxu1 %v3711_v32 }
 0x521   : > { %v723_v37 = vpop.f32.mrb[0].mxu1 }
 0x522   : > { %v2967_v40 = vpop.f32.mrb[1].mxu1 }
 0x523   : > { %v1347_v40 = vsub.s32 4, %v4071_v15 }
 0x525   : > { %v890_v42 = vpop.f32.mrb[2].mxu1  ;;  %v1348_v41 = vrot.slane %v4080_v17, %v1347_v40 }
 0x526   : > { %1227 = vrot.lane.b32.xlu0 %v890_v42, %s3706_s10  ;;  %v2977_v45 = vpop.f32.mrb[3].mxu1 }
 0x529   : > { %v1054_v47 = vpop.f32.mrb[4].mxu1 }
 0x52a   : > { %1231 = vrot.lane.b32.xlu1 %v1054_v47, %s3709_s22  ;;  %v2987_v48 = vpop.f32.mrb[5].mxu1  ;;  %v1426_v47 = vrot.slane %v4080_v17, %v1425_v46 }
 0x55a   : > { %v1222_v49 = vpop.f32.mrb[6].mxu1 }
 0x55b   : > { %1235 = vrot.lane.b32.xlu0 %v1222_v49, %s3710_s18  ;;  %v2997_v50 = vpop.f32.mrb[7].mxu1 }
 0x598   : > { %v1228_v51 = vpop.permute.xlu0 %1227 }
 0x599   : > { %v1238_v53 = vsel %vm562_vm2, %v723_v37, %v1228_v51  ;;  %v472_v37 = vld [vmem:[#allocation11 + $0x30] sm:$0xff] }
 0x59a   : > { %v3172_v39 = vpack.c.bf16 %v473_v38, %v472_v37 }
 0x59c   : > { %v1232_v52 = vpop.permute.xlu1 %1231 }
 0x59d   : > { %v1239_v54 = vsel %vm484_vm0, %v1238_v53, %v1232_v52 }
 0x5cd   : > { %v1236_v55 = vpop.permute.xlu0 %1235 }
 0x5ce   : > { %v1241_v56 = vsel %vm1240_vm4, %v1239_v54, %v1236_v55 }
 0x5cf   : > { %3015 = vmatmul.mubr.msk.f32.vlgmr.msra.gmra.mrb[10].mxu0 %vm1246_vm5, %v1241_v56 }
 0x5d0   : > { %1638 = vmatprep.mubr.f32.mxu0 %v3702_v0 }
 0x6a2   : > { %v1316_v59 = vpop.f32.mrb[10].mxu0 }
 0x6a3   : > { %v1317_v60 = vadd.f32 %v1316_v59, %v1245_v58  ;;  %v3016_v61 = vpop.f32.mrb[11].mxu0  ;;  %v1530_v59 = vld [vmem:[#allocation7 + $0x48] sm:$0xff] }
 0x6a5   : > { %v1320_v62 = vadd.f32 %v1317_v60, %v4066_v13  ;;  %v1532_v60 = vld [vmem:[#allocation7 + $0x58] sm:$0xff] }
 0x6a6   : > { %v3174_v61 = vpack.c.bf16 %v1532_v60, %v1530_v59 }
 0x6a7   : > { %v1321_v63 = vsel %vm484_vm0, %v1320_v62, 0.0 }
 0x6a8   : > { %1322 = vadd.xlane.f32.xlu1 %v1321_v63  ;;  %v1531_v63 = vld [vmem:[#allocation7 + $0x50] sm:$0xff]  ;;  %3175 = vmatprep.subr.bf16.mxu0 %v3174_v61 }
 0x735   : > { %v1323_v1 = vpop.xlane.xlu1 %1322 }
 0x736   : > { %v1325_v2 = vmul.f32 0.03125, %v1323_v1 }
 0x738   : > { %v1326_v3 = vsub.f32 %v1320_v62, %v1325_v2  ;;  %v1529_v62 = vld [vmem:[#allocation7 + $0x40] sm:$0xff]  ;;  %v1534_v2 = vld [vmem:[#allocation7 + $0x68] sm:$0xff] }
 0x739   : > { %v3176_v1 = vpack.c.bf16 %v1531_v63, %v1529_v62 }
 0x73a   : > { %v1327_v4 = vmul.f32 %v1326_v3, %v1326_v3 }
 0x73b   : > { %3177 = vmatpush1.bf16.msra.mxu0 %v3176_v1 }
 0x73c   : > { %v1328_v5 = vsel %vm484_vm0, %v1327_v4, 0.0  ;;  %v1533_v4 = vld [vmem:[#allocation7 + $0x60] sm:$0xff] }
 0x73d   : > { %1329 = vadd.xlane.f32.xlu0 %v1328_v5  ;;  %v3180_v7 = vpack.c.bf16 %v1535_v6, %v1533_v4 }
 0x7ca   : > { %v1330_v13 = vpop.xlane.xlu0 %1329 }
 0x7cb   : > { %v1331_v12 = vmul.f32 0.03125, %v1330_v13  ;;  %v1521_v13 = vsub.s32 7, %v4071_v15 }
 0x7cd   : > { %v1332_v14 = vadd.f32 1e-05, %v1331_v12  ;;  %v1517_v12 = vrot.slane %v4080_v17, %v1516_v11 }
 0x7cf   : > { %3351 = vrsqrt.f32 %v1332_v14 }
 0x7d9   : > { %v3352_v21 = vpop.eup %3351 }
 0x7da   : > { %v1334_v22 = vmul.f32 %v3352_v21, %v1326_v3  ;;  %v1536_v3 = vld [vmem:[#allocation7 + $0x78] sm:$0xff]  ;;  %v1522_v21 = vrot.slane %v4080_v17, %v1521_v13  ;;  %v1570_v17 = vrot.slane %v1562_v24, %v4078_v16 }
 0x7db   : > { %v3178_v5 = vpack.c.bf16 %v1536_v3, %v1534_v2 }
 0x7dc   : > { %v1339_v27 = vmul.f32 %v1338_v20, %v1334_v22 }
 0x7dd   : > { %3179 = vmatprep.subr.bf16.mxu0 %v3178_v5 }
 0x7de   : > { %v1344_v29 = vadd.f32 %v1343_v23, %v1339_v27  ;;  %3181 = vmatpush1.bf16.msra.mxu0 %v3180_v7 }
 0x7df   : > { %3047 = vmatprep.subr.mxu0 %v3702_v0 }
 0x7e0   : > { %3026 = vmatmul.mubr.msk.f32.vlgmr.msra.gmra.mrb[8].mxu1 %vm484_vm0, %v1344_v29 }
 0x7e1   : > { %3164 = vmatpush3.bf16.msra.mxu1 %v3163_v28  ;;  %3044 = vmatprep.mubr.msk.f32.mxu1 %vm3703_vm1, %v3702_v0 }
 0x7e2   : > { %3165 = vmatprep.subr.bf16.mxu1 %v3711_v32 }
 0x7e5   : > { %3167 = vmatpush3.bf16.msra.mxu1 %v3166_v31 }
 0x7e6   : > { %3168 = vmatprep.subr.bf16.mxu1 %v3711_v32 }
 0x7e9   : > { %3170 = vmatpush3.bf16.msra.mxu1 %v3169_v36 }
 0x7ea   : > { %3171 = vmatprep.subr.bf16.mxu1 %v3711_v32 }
 0x7ed   : > { %3173 = vmatpush3.bf16.msra.mxu1 %v3172_v39 }
 0x7ee   : > { %3052 = vmatprep.subr.mxu1 %v3702_v0 }
 0x8b3   : > { %v1418_v42 = vpop.f32.mrb[8].mxu1 }
 0x8b4   : > { %v1419_v43 = vadd.f32 %v1418_v42, %v1348_v41  ;;  %v3027_v44 = vpop.f32.mrb[9].mxu1 }
 0x8b6   : > { %v1422_v45 = vmax.f32 %v1419_v43, 0.0 }
 0x8b8   : > { %3045 = vmatmul.mubr.msk.f32.vlgmr.msra.gmra.mrb[10].mxu1 %vm1246_vm5, %v1422_v45 }
 0x8b9   : > { %3054 = vmatprep.mubr.msk.f32.mxu1 %vm3703_vm1, %v3702_v0 }
 0x98b   : > { %v1496_v48 = vpop.f32.mrb[10].mxu1 }
 0x98c   : > { %v1497_v49 = vadd.f32 %v1496_v48, %v1426_v47  ;;  %v3046_v50 = vpop.f32.mrb[11].mxu1 }
 0x98e   : > { %v1500_v51 = vadd.f32 %v1497_v49, %v1344_v29 }
 0x990   : > { %v1501_v52 = vsel %vm484_vm0, %v1500_v51, 0.0 }
 0x991   : > { %1502 = vadd.xlane.f32.xlu0 %v1501_v52 }
 0xa1e   : > { %v1503_v53 = vpop.xlane.xlu0 %1502 }
 0xa1f   : > { %v1504_v54 = vmul.f32 0.03125, %v1503_v53 }
 0xa21   : > { %v1505_v55 = vsub.f32 %v1500_v51, %v1504_v54 }
 0xa23   : > { %v1506_v56 = vmul.f32 %v1505_v55, %v1505_v55 }
 0xa25   : > { %v1507_v58 = vsel %vm484_vm0, %v1506_v56, 0.0 }
 0xa26   : > { %1508 = vadd.xlane.f32.xlu1 %v1507_v58 }
 0xab3   : > { %v1509_v8 = vpop.xlane.xlu1 %1508 }
 0xab4   : > { %v1510_v9 = vmul.f32 0.03125, %v1509_v8 }
 0xab6   : > { %v1511_v10 = vadd.f32 1e-05, %v1510_v9 }
 0xab8   : > { %3353 = vrsqrt.f32 %v1511_v10 }
 0xac2   : > { %v3354_v14 = vpop.eup %3353 }
 0xac3   : > { %v1513_v20 = vmul.f32 %v3354_v14, %v1505_v55 }
 0xac5   : > { %v1518_v22 = vmul.f32 %v1517_v12, %v1513_v20 }
 0xac7   : > { %v4231_v23 = vadd.f32 %v1522_v21, %v1518_v22 }
 0xac9   : > { %2852 = vmatmul.mubr.msk.f32.vlgmr.msra.gmra.mrb[12].mxu0 %vm484_vm0, %v4231_v23 }
 0xaca   : > { %3049 = vmatprep.mubr.msk.f32.mxu0 %vm3703_vm1, %v3702_v0 }
 0xb9c   : > { %v1640_v27 = vpop.f32.mrb[12].mxu0 }
 0xb9d   : > { %v4241_v28 = vadd.f32 %v1640_v27, %v1566_v26  ;;  %v1642_v29 = vpop.f32.mrb[13].mxu0 }
 0xb9e   : > { %v4252_v30 = vadd.f32 %v1642_v29, %v1570_v17 }
 0xb9f   : > { %1813 = vrot.lane.b32.xlu1 %v4241_v28, %s3707_s13  ;;  %1646 = vrot.lane.b32.xlu0 %v4241_v28, %s3705_s26 }
 0xba3   : > { %1811 = vrot.lane.b32.xlu1 %v4241_v28, %s3704_s24  ;;  %1980 = vrot.lane.b32.xlu0 %v4241_v28, %s3706_s10 }
 0xba7   : > { %1978 = vrot.lane.b32.xlu1 %v4241_v28, %s3709_s22  ;;  %2145 = vrot.lane.b32.xlu0 %v4252_v30, %s3708_s19 }
 0xbab   : > { %2143 = vrot.lane.b32.xlu1 %v4252_v30, %s3705_s26  ;;  %s3575_s26 = scalar_lea.vmem %s4370_s2, 1024 }
 0xbac   : > { %p3576_p12 = scmp.ne.s32.totalorder %s4370_s2, %s3575_s26 }
 0xbae   : > { %p3577_p6 = pnand %p3576_p12, %p4493_p13 }
 0xbb0   : > { %p3578_p9 = pneg %p3577_p6 }
 0xc11   : > { %v1814_v31 = vpop.permute.xlu1 %1813  ;;  %v1647_v34 = vpop.permute.xlu0 %1646 }
 0xc12   : > { %3048 = vmatpush3.xpose.msk.msra.mxu0 %vm562_vm2, %v1647_v34 }
 0xc13   : > { %3057 = vmatprep.subr.mxu0 %v3702_v0 }
 0xc15   : > { %v1812_v16 = vpop.permute.xlu1 %1811  ;;  %3050 = vmatmul.mubr.msk.f32.vlgmr.msra.gmra.mrb[14].mxu0 %vm562_vm2, %v4241_v28  ;;  %v1981_v35 = vpop.permute.xlu0 %1980 }
 0xc16   : > { %3058 = vmatpush3.xpose.msk.msra.mxu0 %vm562_vm2, %v1814_v31  ;;  %3059 = vmatprep.mubr.msk.f32.mxu0 %vm3703_vm1, %v3702_v0 }
 0xc17   : > { %3067 = vmatprep.subr.mxu0 %v3702_v0 }
 0xc19   : > { %3060 = vmatmul.mubr.msk.f32.vlgmr.msra.gmra.mrb[16].mxu0 %vm562_vm2, %v1812_v16  ;;  %v1979_v36 = vpop.permute.xlu1 %1978  ;;  %v2146_v37 = vpop.permute.xlu0 %2145 }
 0xc1a   : > { %3068 = vmatpush3.xpose.msk.msra.mxu0 %vm562_vm2, %v1981_v35  ;;  %3069 = vmatprep.mubr.msk.f32.mxu0 %vm3703_vm1, %v3702_v0 }
 0xc1b   : > { %3077 = vmatprep.subr.mxu0 %v3702_v0 }
 0xc1d   : > { %3070 = vmatmul.mubr.msk.f32.vlgmr.msra.gmra.mrb[18].mxu0 %vm562_vm2, %v1979_v36  ;;  %v2144_v38 = vpop.permute.xlu1 %2143 }
 0xc1e   : > { %3078 = vmatpush3.xpose.msk.msra.mxu0 %vm562_vm2, %v2146_v37  ;;  %3079 = vmatprep.mubr.msk.f32.mxu0 %vm3703_vm1, %v3702_v0 }
 0xc1f   : > { %3182 = vmatprep.subr.bf16.mxu0 %v3711_v32 }
 0xc21   : > { %3080 = vmatmul.mubr.msk.f32.vlgmr.msra.gmra.mrb[20].mxu0 %vm562_vm2, %v2144_v38 }
 0xc22   : > { %3103 = vmatprep.mubr.msk.f32.mxu0 %vm3703_vm1, %v3702_v0 }
 0xce8   : > { %v1718_v39 = vpop.f32.mrb[14].mxu0 }
 0xce9   : > { %v1722_v41 = vmul.f32 0.25, %v1718_v39  ;;  %v3051_v42 = vpop.f32.mrb[15].mxu0 }
 0xceb   : > { %v1723_v43 = vadd.f32 %v4125_v33, %v1722_v41 }
 0xcec   : > { %v1885_v44 = vpop.f32.mrb[16].mxu0 }
 0xced   : > { %v1889_v45 = vmul.f32 0.25, %v1885_v44  ;;  %v3061_v47 = vpop.f32.mrb[17].mxu0  ;;  %v1724_v48 = vsel %vm639_vm3, %v1723_v43, -inf  ;;  %v1539_v44 = vld [vmem:[#allocation8 + $0x48] sm:$0xff] }
 0xcee   : > { %1725 = vmax.xlane.f32.xlu0 %v1724_v48  ;;  %v1541_v48 = vld [vmem:[#allocation8 + $0x58] sm:$0xff] }
 0xcef   : > { %v1890_v49 = vadd.f32 %v4125_v33, %v1889_v45  ;;  %v1540_v45 = vld [vmem:[#allocation8 + $0x50] sm:$0xff] }
 0xcf0   : > { %v2052_v50 = vpop.f32.mrb[18].mxu0 }
 0xcf1   : > { %v2056_v51 = vmul.f32 0.25, %v2052_v50  ;;  %v3071_v52 = vpop.f32.mrb[19].mxu0  ;;  %v1891_v53 = vsel %vm639_vm3, %v1890_v49, -inf  ;;  %v1542_v50 = vld [vmem:[#allocation8 + $0x60] sm:$0xff] }
 0xcf2   : > { %1892 = vmax.xlane.f32.xlu1 %v1891_v53  ;;  %v1544_v53 = vld [vmem:[#allocation8 + $0x70] sm:$0xff] }
 0xcf3   : > { %v2057_v54 = vadd.f32 %v4125_v33, %v2056_v51  ;;  %v1543_v51 = vld [vmem:[#allocation8 + $0x68] sm:$0xff] }
 0xcf4   : > { %v2217_v55 = vpop.f32.mrb[20].mxu0  ;;  %v3189_v52 = vpack.c.bf16 %v1543_v51, %v1542_v50  ;;  %v1559_v50 = vld [vmem:[#allocation11 + $0x78] sm:$0xff] }
 0xcf5   : > { %v2221_v56 = vmul.f32 0.25, %v2217_v55  ;;  %v3081_v58 = vpop.f32.mrb[21].mxu0  ;;  %v2058_v59 = vsel %vm639_vm3, %v2057_v54, -inf }
 0xcf6   : > { %2059 = vmax.xlane.f32.xlu0 %v2058_v59 }
 0xcf7   : > { %v2222_v60 = vadd.f32 %v4125_v33, %v2221_v56 }
 0xcf9   : > { %v2223_v61 = vsel %vm639_vm3, %v2222_v60, -inf }
 0xcfa   : > { %2224 = vmax.xlane.f32.xlu0 %v2223_v61 }
 0xd03   : > { %1735 = vrot.lane.b32.xlu1 %v4241_v28, %s3708_s19 }
 0xd7b   : > { %v1726_v62 = vpop.xlane.xlu0 %1725 }
 0xd7c   : > { %v1727_v63 = vsub.f32 %v1723_v43, %v1726_v62 }
 0xd7e   : > { %v1728_v1 = vmul.f32 1.442695, %v1727_v63 }
 0xd7f   : > { %v1893_v2 = vpop.xlane.xlu1 %1892 }
 0xd80   : > { %3355 = vpow2.f32 %v1728_v1  ;;  %v1894_v3 = vsub.f32 %v1890_v49, %v1893_v2  ;;  %v3186_v49 = vpack.c.bf16 %v1541_v48, %v1540_v45  ;;  %v1555_v45 = vld [vmem:[#allocation11 + $0x58] sm:$0xff]  ;;  %v1557_v48 = vld [vmem:[#allocation11 + $0x68] sm:$0xff] }
 0xd82   : > { %v1895_v4 = vmul.f32 1.442695, %v1894_v3 }
 0xd83   : > { %v1736_v5 = vpop.permute.xlu1 %1735  ;;  %v2060_v6 = vpop.xlane.xlu0 %2059 }
 0xd84   : > { %3357 = vpow2.f32 %v1895_v4  ;;  %v2061_v7 = vsub.f32 %v2057_v54, %v2060_v6  ;;  %3053 = vmatpush3.msra.mxu1 %v1736_v5  ;;  %v1545_v54 = vld [vmem:[#allocation8 + $0x78] sm:$0xff] }
 0xd85   : > { %3062 = vmatprep.subr.mxu1 %v3702_v0  ;;  %v3192_v55 = vpack.c.bf16 %v1545_v54, %v1544_v53 }
 0xd86   : > { %v2062_v33 = vmul.f32 1.442695, %v2061_v7 }
 0xd87   : > { %v2225_v8 = vpop.xlane.xlu0 %2224 }
 0xd88   : > { %3359 = vpow2.f32 %v2062_v33  ;;  %v2226_v9 = vsub.f32 %v2222_v60, %v2225_v8  ;;  %v2328_v33 = vrot.slane %v4237_v25, %v1244_v57  ;;  %v1549_v57 = vld [vmem:[#allocation10 + $0x30] sm:$0xff] }
 0xd8a   : > { %v3356_v10 = vpop.eup %3355  ;;  %v2227_v12 = vmul.f32 1.442695, %v2226_v9 }
 0xd8b   : > { %v1730_v14 = vsel %vm639_vm3, %v3356_v10, 0.0 }
 0xd8c   : > { %3361 = vpow2.f32 %v2227_v12  ;;  %1731 = vadd.xlane.f32.xlu1 %v1730_v14 }
 0xd8e   : > { %v3358_v20 = vpop.eup %3357 }
 0xd8f   : > { %v1897_v21 = vsel %vm639_vm3, %v3358_v20, 0.0 }
 0xd90   : > { %1898 = vadd.xlane.f32.xlu0 %v1897_v21 }
 0xd92   : > { %v3360_v22 = vpop.eup %3359 }
 0xd93   : > { %v2064_v26 = vsel %vm639_vm3, %v3360_v22, 0.0 }
 0xd94   : > { %2065 = vadd.xlane.f32.xlu1 %v2064_v26 }
 0xd96   : > { %v3362_v27 = vpop.eup %3361 }
 0xd97   : > { %v2229_v29 = vsel %vm639_vm3, %v3362_v27, 0.0 }
 0xd98   : > { %2230 = vadd.xlane.f32.xlu0 %v2229_v29  ;;  %v1547_v29 = vld [vmem:[#allocation10 + $0x20] sm:$0xff] }
 0xda5   : > { %2234 = vrot.lane.b32.xlu1 %v4252_v30, %s3704_s24  ;;  %s2617_s24 = scalar_lea.sflag [#allocation16], %s4033_s3 }
 0xdae   : > { %1902 = vrot.lane.b32.xlu0 %v4241_v28, %s3710_s18 }
 0xe19   : > { %v1732_v24 = vpop.xlane.xlu1 %1731 }
 0xe1a   : > { %3363 = vrcp.f32 %v1732_v24  ;;  %v1548_v24 = vld [vmem:[#allocation10 + $0x28] sm:$0xff] }
 0xe1d   : > { %v1899_v17 = vpop.xlane.xlu0 %1898 }
 0xe1e   : > { %3365 = vrcp.f32 %v1899_v17  ;;  %v3195_v17 = vpack.c.bf16 %v1548_v24, %v1547_v29 }
 0xe21   : > { %v2066_v31 = vpop.xlane.xlu1 %2065 }
 0xe22   : > { %3367 = vrcp.f32 %v2066_v31  ;;  %v1550_v31 = vld [vmem:[#allocation10 + $0x38] sm:$0xff] }
 0xe24   : > { %v3364_v34 = vpop.eup %3363 }
 0xe25   : > { %v1734_v16 = vmul.f32 %v3364_v34, %v3356_v10  ;;  %v2231_v35 = vpop.xlane.xlu0 %2230  ;;  %v2235_v41 = vpop.permute.xlu1 %2234  ;;  %v3198_v34 = vpack.c.bf16 %v1550_v31, %v1549_v57 }
 0xe26   : > { %3369 = vrcp.f32 %v2231_v35 }
 0xe27   : > { %2868 = vst.msk [vmem:[%s4147_s14 + $0x20] sm:$0xff] %vm639_vm3, %v1734_v16  ;;  %3055 = vmatmul.mubr.msk.f32.vlgmr.msra.gmra.mrb[12].mxu1 %vm639_vm3, %v1734_v16 }
 0xe28   : > { %v3366_v36 = vpop.eup %3365  ;;  %3064 = vmatprep.mubr.msk.f32.mxu1 %vm3703_vm1, %v3702_v0 }
 0xe29   : > { %v1901_v28 = vmul.f32 %v3366_v36, %v3358_v20  ;;  %v1903_v37 = vpop.permute.xlu0 %1902  ;;  %v2419_v36 = vrot.slane %v4237_v25, %v1337_v18  ;;  %v1556_v18 = vld [vmem:[#allocation11 + $0x60] sm:$0xff] }
 0xe2a   : > { %3063 = vmatpush3.msra.mxu1 %v1903_v37 }
 0xe2b   : > { %2869 = vst.msk [vmem:[%s4147_s14 + $0x28] sm:$0xff] %vm639_vm3, %v1901_v28  ;;  %3065 = vmatmul.mubr.msk.f32.vlgmr.msra.gmra.mrb[14].mxu1 %vm639_vm3, %v1901_v28  ;;  %3072 = vmatprep.subr.mxu1 %v3702_v0 }
 0xe2c   : > { %v3368_v38 = vpop.eup %3367  ;;  %3073 = vmatpush3.msra.mxu1 %v4252_v30  ;;  %3074 = vmatprep.mubr.msk.f32.mxu1 %vm3703_vm1, %v3702_v0  ;;  %v1538_v30 = vld [vmem:[#allocation8 + $0x40] sm:$0xff] }
 0xe2d   : > { %v2068_v39 = vmul.f32 %v3368_v38, %v3360_v22  ;;  %3082 = vmatprep.subr.mxu1 %v3702_v0  ;;  %v3183_v47 = vpack.c.bf16 %v1539_v44, %v1538_v30  ;;  %v2424_v38 = vrot.slane %v4237_v25, %v1342_v19  ;;  %v1554_v44 = vld [vmem:[#allocation11 + $0x50] sm:$0xff]  ;;  %v3207_v19 = vpack.c.bf16 %v1557_v48, %v1556_v18 }
 0xe2f   : > { %2870 = vst.msk [vmem:[%s4147_s14 + $0x30] sm:$0xff] %vm639_vm3, %v2068_v39  ;;  %3075 = vmatmul.mubr.msk.f32.vlgmr.msra.gmra.mrb[16].mxu1 %vm639_vm3, %v2068_v39  ;;  %3184 = vmatpush3.bf16.msra.mxu0 %v3183_v47  ;;  %v1552_v39 = vld [vmem:[#allocation11 + $0x40] sm:$0xff]  ;;  %v3204_v47 = vpack.c.bf16 %v1555_v45, %v1554_v44 }
 0xe30   : > { %v3370_v42 = vpop.eup %3369  ;;  %3083 = vmatpush3.msra.mxu1 %v2235_v41  ;;  %3084 = vmatprep.mubr.msk.f32.mxu1 %vm3703_vm1, %v3702_v0  ;;  %v1553_v41 = vld [vmem:[#allocation11 + $0x48] sm:$0xff] }
 0xe31   : > { %v2233_v43 = vmul.f32 %v3370_v42, %v3362_v27  ;;  %3194 = vmatprep.subr.bf16.mxu1 %v3711_v32  ;;  %3185 = vmatprep.subr.bf16.mxu0 %v3711_v32 }
 0xe33   : > { %2871 = vst.msk [vmem:[%s4147_s14 + $0x38] sm:$0xff] %vm639_vm3, %v2233_v43  ;;  %3085 = vmatmul.mubr.msk.f32.vlgmr.msra.gmra.mrb[18].mxu1 %vm639_vm3, %v2233_v43  ;;  %3187 = vmatpush3.bf16.msra.mxu0 %v3186_v49  ;;  %v3201_v43 = vpack.c.bf16 %v1553_v41, %v1552_v39  ;;  %v1558_v49 = vld [vmem:[#allocation11 + $0x70] sm:$0xff] }
 0xe34   : > { %3114 = vmatprep.mubr.msk.f32.mxu1 %vm3703_vm1, %v3702_v0  ;;  %3188 = vmatprep.subr.bf16.mxu0 %v3711_v32  ;;  %v3210_v51 = vpack.c.bf16 %v1559_v50, %v1558_v49 }
 0xe35   : > { %3196 = vmatpush3.bf16.msra.mxu1 %v3195_v17 }
 0xe36   : > { %3197 = vmatprep.subr.bf16.mxu1 %v3711_v32 }
 0xe37   : > { %3190 = vmatpush3.bf16.msra.mxu0 %v3189_v52  ;;  %v2429_v52 = vrot.slane %v4237_v25, %v1347_v40 }
 0xe38   : > { %3191 = vmatprep.subr.bf16.mxu0 %v3711_v32 }
 0xe39   : > { %3199 = vmatpush3.bf16.msra.mxu1 %v3198_v34 }
 0xe3a   : > { %3200 = vmatprep.subr.bf16.mxu1 %v3711_v32 }
 0xe3b   : > { %3193 = vmatpush3.bf16.msra.mxu0 %v3192_v55 }
 0xefa   : > { %v1807_v56 = vpop.f32.mrb[12].mxu1 }
 0xefb   : > { %v3056_v58 = vpop.f32.mrb[13].mxu1 }
 0xefe   : > { %v1974_v59 = vpop.f32.mrb[14].mxu1 }
 0xeff   : > { %2311 = vrot.lane.b32.xlu1 %v1974_v59, %s3706_s10  ;;  %v3066_v60 = vpop.f32.mrb[15].mxu1  ;;  %s3712_s10 = smov [#allocation15]  }
 0xf00   : > { %s3579_s13 = sshll.u32 %s3712_s10, 4  ;;  %s3580_s13 = int_to_ptr.vmem [resolvable:$false] %s3579_s13 }
 0xf01   : > { %s3581_s19 = scalar_lea.vmem %s3580_s13, 2048  ;;  %p3582_p0 = scmp.lt.s32.totalorder %s4370_s2, %s3580_s13 }
 0xf02   : > { %v2138_v61 = vpop.f32.mrb[16].mxu1  ;;  %p3583_p5 = scmp.lt.s32.totalorder %s3581_s19, %s3575_s26 }
 0xf03   : > { %2315 = vrot.lane.b32.xlu0 %v2138_v61, %s3709_s22  ;;  %v3076_v62 = vpop.f32.mrb[17].mxu1 }
 0xf04   : > { %p3584_p3 = por %p3583_p5, %p3582_p0 }
 0xf06   : > { %v2306_v63 = vpop.f32.mrb[18].mxu1  ;;  %p3585_p2 = pnand %p3584_p3, %p3578_p9 }
 0xf07   : > { %2319 = vrot.lane.b32.xlu1 %v2306_v63, %s3710_s18  ;;  %v3086_v1 = vpop.f32.mrb[19].mxu1 }
 0xf71   : > { %v2312_v2 = vpop.permute.xlu1 %2311 }
 0xf72   : > { %v2322_v4 = vsel %vm562_vm2, %v1807_v56, %v2312_v2 }
 0xf75   : > { %v2316_v3 = vpop.permute.xlu0 %2315 }
 0xf76   : > { %v2323_v5 = vsel %vm484_vm0, %v2322_v4, %v2316_v3 }
 0xf79   : > { %v2320_v6 = vpop.permute.xlu1 %2319 }
 0xf7a   : > { %v2324_v7 = vsel %vm1240_vm4, %v2323_v5, %v2320_v6 }
 0xf7b   : > { %3104 = vmatmul.mubr.msk.f32.vlgmr.msra.gmra.mrb[22].mxu0 %vm1246_vm5, %v2324_v7 }
0x104e   : > { %v2398_v8 = vpop.f32.mrb[22].mxu0 }
0x104f   : > { %v2399_v9 = vadd.f32 %v2398_v8, %v2328_v33  ;;  %v3105_v10 = vpop.f32.mrb[23].mxu0 }
0x1051   : > { %v2402_v12 = vadd.f32 %v2399_v9, %v4231_v23 }
0x1053   : > { %v2403_v14 = vsel %vm484_vm0, %v2402_v12, 0.0 }
0x1054   : > { %2404 = vadd.xlane.f32.xlu0 %v2403_v14 }
0x10e1   : > { %v2405_v20 = vpop.xlane.xlu0 %2404 }
0x10e2   : > { %v2406_v21 = vmul.f32 0.03125, %v2405_v20 }
0x10e4   : > { %v2407_v22 = vsub.f32 %v2402_v12, %v2406_v21 }
0x10e6   : > { %v2408_v26 = vmul.f32 %v2407_v22, %v2407_v22 }
0x10e8   : > { %v2409_v27 = vsel %vm484_vm0, %v2408_v26, 0.0 }
0x10e9   : > { %2410 = vadd.xlane.f32.xlu1 %v2409_v27 }
0x1176   : > { %v2411_v23 = vpop.xlane.xlu1 %2410 }
0x1177   : > { %v2412_v16 = vmul.f32 0.03125, %v2411_v23 }
0x1179   : > { %v2413_v35 = vadd.f32 1e-05, %v2412_v16 }
0x117b   : > { %3371 = vrsqrt.f32 %v2413_v35 }
0x1185   : > { %v3372_v28 = vpop.eup %3371 }
0x1186   : > { %v2415_v37 = vmul.f32 %v3372_v28, %v2407_v22 }
0x1188   : > { %v2420_v42 = vmul.f32 %v2419_v36, %v2415_v37 }
0x118a   : > { %v2425_v30 = vadd.f32 %v2424_v38, %v2420_v42 }
0x118c   : > { %3115 = vmatmul.mubr.msk.f32.vlgmr.msra.gmra.mrb[20].mxu1 %vm484_vm0, %v2425_v30 }
0x118d   : > { %3202 = vmatpush3.bf16.msra.mxu1 %v3201_v43  ;;  %3133 = vmatprep.mubr.msk.f32.mxu1 %vm3703_vm1, %v3702_v0 }
0x118e   : > { %3203 = vmatprep.subr.bf16.mxu1 %v3711_v32 }
0x1191   : > { %3205 = vmatpush3.bf16.msra.mxu1 %v3204_v47 }
0x1192   : > { %3206 = vmatprep.subr.bf16.mxu1 %v3711_v32 }
0x1195   : > { %3208 = vmatpush3.bf16.msra.mxu1 %v3207_v19 }
0x1196   : > { %3209 = vmatprep.subr.bf16.mxu1 %v3711_v32  ;;  %v2507_v32 = vrot.slane %v4237_v25, %v1425_v46 }
0x1199   : > { %3211 = vmatpush3.bf16.msra.mxu1 %v3210_v51 }
0x125f   : > { %v2499_v0 = vpop.f32.mrb[20].mxu1 }
0x1260   : > { %v2500_v53 = vadd.f32 %v2499_v0, %v2429_v52  ;;  %v3116_v54 = vpop.f32.mrb[21].mxu1 }
0x1262   : > { %v2503_v55 = vmax.f32 %v2500_v53, 0.0 }
0x1264   : > { %3134 = vmatmul.mubr.msk.f32.vlgmr.msra.gmra.mrb[22].mxu1 %vm1246_vm5, %v2503_v55 }
0x1337   : > { %v2577_v56 = vpop.f32.mrb[22].mxu1 }
0x1338   : > { %v2578_v58 = vadd.f32 %v2577_v56, %v2507_v32  ;;  %v3135_v59 = vpop.f32.mrb[23].mxu1 }
0x133a   : > { %v2581_v60 = vadd.f32 %v2578_v58, %v2425_v30 }
0x133c   : > { %v2582_v40 = vsel %vm484_vm0, %v2581_v60, 0.0 }
0x133d   : > { %2583 = vadd.xlane.f32.xlu0 %v2582_v40 }
0x13ca   : > { %v2584_v61 = vpop.xlane.xlu0 %2583 }
0x13cb   : > { %v2585_v62 = vmul.f32 0.03125, %v2584_v61 }
0x13cd   : > { %v2586_v63 = vsub.f32 %v2581_v60, %v2585_v62 }
0x13cf   : > { %v2587_v1 = vmul.f32 %v2586_v63, %v2586_v63 }
0x13d1   : > { %v2588_v2 = vsel %vm484_vm0, %v2587_v1, 0.0 }
0x13d2   : > { %2589 = vadd.xlane.f32.xlu0 %v2588_v2 }
0x13d3   : > { %3588 = shalt.err (!%p3585_p2)
}
0x13d4   : > { %s3589_s22 = scalar_lea.hbm %s4368_s17, 1024  ;;  %s3593_s14 = scalar_lea.hbm %s4461_s8, 2048 }
0x13d5   : > { %p3590_p4 = scmp.ne.s32.totalorder %s4368_s17, %s3589_s22  ;;  %p3594_p10 = scmp.lt.u32.totalorder %s4368_s17, %s4461_s8 }
0x13d6   : > { %p3595_p1 = scmp.lt.u32.totalorder %s3593_s14, %s3589_s22  ;;  %p3597_p12 = scmp.lt.u32.totalorder %s3589_s22, %s4368_s17 }
0x13d7   : > { %p3591_p8 = pnand %p3590_p4, %p4493_p13 }
0x13d8   : > { %p3596_p11 = por %p3595_p1, %p3594_p10 }
0x13d9   : > { %p3592_p7 = pneg %p3591_p8 }
0x13da   : > { %p3598_p6 = por %p3597_p12, %p3596_p11 }
0x13dc   : > { %p3599_p9 = pnand %p3598_p6, %p3592_p7 }
0x13de   : > { %3602 = shalt.err (!%p3599_p9)
}
0x13df   : > { %s3713_s12 = smov 128   ;;  %s3714_s26 = smov 8   ;;  %v2598_v5 = vrot.slane %v4237_v25, %v1516_v11  ;;  %v2603_v33 = vrot.slane %v4237_v25, %v1521_v13 }
0x13e0   : > { %3237 = dma.vmem_to_hbm [thread:$0]  (%p4493_p13), %s4370_s2, 1024, %s4368_s17, %s2617_s24, %s3713_s12, %s3713_s12, %s3714_s26  }
0x13e1   : > { %s2874_s10 = sshll.u32 %s3782_s11, 7  ;;  %s430_s13 = scalar_lea.vmem [#allocation14], %s2827_s16 }
0x13e2   : > { %s2630_s2 = sshll.u32 %s430_s13, 4  ;;  %s4408_s19 = scalar_lea.hbm %s4460_s7, %s2874_s10  ;;  %s4410_s2 = int_to_ptr.vmem [resolvable:$true] %s2630_s2 }
0x13e3   : > { %s2612_s22 = scalar_lea.sflag [#allocation4], %s4033_s3  ;;  %s3603_s18 = scalar_lea.vmem %s4410_s2, 128 }
0x13e4   : > { %p3604_p0 = scmp.ne.s32.totalorder %s4410_s2, %s3603_s18  ;;  %s3715_s11 = smov [#allocation14]  }
0x13e5   : > { %s3607_s16 = sshll.u32 %s3715_s11, 4  ;;  %s3608_s16 = int_to_ptr.vmem [resolvable:$false] %s3607_s16 }
0x13e6   : > { %p3605_p5 = pnand %p3604_p0, %p4493_p13  ;;  %s3609_s15 = scalar_lea.vmem %s3608_s16, 256 }
0x13e7   : > { %p3610_p2 = scmp.lt.s32.totalorder %s4410_s2, %s3608_s16  ;;  %p3611_p4 = scmp.lt.s32.totalorder %s3609_s15, %s3603_s18 }
0x13e8   : > { %p3606_p3 = pneg %p3605_p5 }
0x13e9   : > { %p3612_p8 = por %p3611_p4, %p3610_p2 }
0x13eb   : > { %p3613_p7 = pnand %p3612_p8, %p3606_p3 }
0x145f   : > { %v2590_v46 = vpop.xlane.xlu0 %2589 }
0x1460   : > { %v2591_v3 = vmul.f32 0.03125, %v2590_v46 }
0x1462   : > { %v2592_v4 = vadd.f32 1e-05, %v2591_v3 }
0x1464   : > { %3373 = vrsqrt.f32 %v2592_v4 }
0x146e   : > { %v3374_v6 = vpop.eup %3373 }
0x146f   : > { %v2594_v7 = vmul.f32 %v3374_v6, %v2586_v63 }
0x1471   : > { %v2599_v8 = vmul.f32 %v2598_v5, %v2594_v7 }
0x1473   : > { %v2604_v9 = vadd.f32 %v2603_v33, %v2599_v8 }
0x1475   : > { %2610 = vst.msk [vmem:[%s430_s13] sm:$0xff] %vm484_vm0, %v2604_v9 }
0x1476   : > { %3616 = shalt.err (!%p3613_p7)
}
0x1477   : > { %s3617_s3 = scalar_lea.hbm %s4408_s19, 128  ;;  %s3621_s0 = scalar_lea.hbm %s4460_s7, 256 }
0x1478   : > { %p3618_p10 = scmp.ne.s32.totalorder %s4408_s19, %s3617_s3  ;;  %p3622_p12 = scmp.lt.u32.totalorder %s4408_s19, %s4460_s7 }
0x1479   : > { %p3623_p6 = scmp.lt.u32.totalorder %s3621_s0, %s3617_s3  ;;  %p3625_p0 = scmp.lt.u32.totalorder %s3617_s3, %s4408_s19 }
0x147a   : > { %p3619_p1 = pnand %p3618_p10, %p4493_p13 }
0x147b   : > { %p3624_p9 = por %p3623_p6, %p3622_p12 }
0x147c   : > { %p3620_p11 = pneg %p3619_p1 }
0x147d   : > { %p3626_p5 = por %p3625_p0, %p3624_p9 }
0x147f   : > { %p3627_p3 = pnand %p3626_p5, %p3620_p11 }
0x1481   : > { %3630 = shalt.err (!%p3627_p3)
}
0x1482   : > { %3236 = dma.vmem_to_hbm [thread:$0]  (%p4493_p13), %s4410_s2, 128, %s4408_s19, %s2612_s22  }
0x1483 PF: > { %s2658_s10 = sand.u32 1, %s3677_s27   ;;  %p4494_p2 = scmp.ne.s32.totalorder %s4481_s25, 0 }
0x1484   : > { %p4495_p4 = scmp.ge.s32.totalorder %s3689_s30, 2  ;;  %s2659_s13 = scalar_lea.sflag [#allocation4], %s2658_s10 }
0x1486   : > { %p3264_p8 = pnand %p4495_p4, %p4494_p2 }
0x1488   : > { %3668 = dma.done.wait (!%p3264_p8), %s2659_s13, 128  }
0x1489   : > { %3670 = vsyncadd (!%p3264_p8), %s2659_s13, 4294967168  ;;  %s2668_s17 = scalar_lea.sflag [#allocation16], %s2658_s10 }
0x148a   : > { %3672 = dma.done.wait (!%p3264_p8), %s2668_s17, 1024  }
0x148b   : > { %3674 = vsyncadd (!%p3264_p8), %s2668_s17, 4294966272  ;;  %p30_p13 = scmp.ge.s32.totalorder %s3930_s23, 4   ;;  %s4496_s27 = smov %s3681_s28 }
0x148c   : > { %s4497_s28 = smov %s3685_s29  ;;  %s4498_s29 = smov %s3942_s9 }
0x148d   : > { %s4499_s30 = smov %s3930_s23  ;;  %32 = sbr.rel (!%p30_p13) target bundleno = 15 (0xf), region = 149 }
0x1494   :  { %2673 = vsyncpa [#allocation3], 1 }
0x1495   :  { %2675 = vsyncpa [#allocation3 + $0x1], 1 }
0x1496   :  { %2676 = vsyncpa [#allocation6], 1 }
0x1497   :  { %2678 = vsyncpa [#allocation6 + $0x1], 1 }
0x1498   :  { %2679 = vsyncpa [#allocation9], 1 }
0x1499   :  { %2680 = vsyncpa [#allocation12], 1 }
0x149a   :  { %2681 = vsyncpa [#allocation4], 1 }
0x149b   :  { %2683 = vsyncpa [#allocation4 + $0x1], 1 }
0x149c   :  { %2684 = vsyncpa [#allocation16], 1 }
0x149d   :  { %2686 = vsyncpa [#allocation16 + $0x1], 1 }

</bundles_post_ra>
